<compile_context>
chip_gen: v6e
topology: v6e:2x2x1
jax: 0.10.0
libtpu: 0.0.40
codegen_flags: <defaults>
</compile_context>

<pallas_src>
import functools

import jax
import jax.numpy as jnp
from jax.experimental import pallas as pl
from jax.experimental.pallas import tpu as pltpu


def matching_attention_kernel(vis_ref, emb_ref, wvbig_ref, we_ref, c_ref,
                              out_ref, *, regions, visual_dim):
    R, V = regions, visual_dim
    tb = vis_ref.shape[0]

    # ---- visual contribution to every region score, directly lane-major:
    # one bf16 MXU matmul (TB, R*V) @ (R*V, R) -> (TB, R) with f32 accumulation.
    s_vis = jnp.dot(vis_ref[...], wvbig_ref[...],
                    preferred_element_type=jnp.float32)                    # (TB, R)

    # ---- embedding contribution (identical for all regions of an example):
    # the two Linears compose exactly, so this is a VPU multiply + lane reduce.
    s_emb = (jnp.sum(emb_ref[...] * we_ref[...], axis=-1, keepdims=True)
             + c_ref[...])                                                 # (TB, 1)

    # ---- ReLU then softmax over the 36 regions (single lane-axis reduce).
    score = jnp.maximum(s_vis + s_emb, 0.0)                                # (TB, R)
    mx = jnp.max(score, axis=-1, keepdims=True)                            # (TB, 1)
    ex = jnp.exp(score - mx)                                               # (TB, R)
    denom = jnp.sum(ex, axis=-1, keepdims=True)                            # (TB, 1)
    wgt = ex * pl.reciprocal(denom, approx=True)                           # (TB, R) f32

    # ---- attention-weighted sum of the visual features over regions (VPU).
    if V % 128 != 0 and (2 * V) % 128 == 0 and R % 2 == 0:
        # Region-PAIR epilogue: every vis slice starts on a 128-lane boundary
        # and every VPU op is full lane width.  Weight for pair p puts
        # wgt[:, 2p] in lanes [0, V) and wgt[:, 2p+1] in lanes [V, 2V).
        lane = jax.lax.broadcasted_iota(jnp.int32, (tb, 2 * V), 1)
        lo_mask = lane < V                                                 # hoisted
        acc = jnp.zeros((tb, 2 * V), dtype=jnp.float32)
        for p in range(R // 2):                                            # static, R//2 = 18
            w_lo = wgt[:, 2 * p:2 * p + 1]                                 # (TB, 1)
            w_hi = wgt[:, 2 * p + 1:2 * p + 2]                             # (TB, 1)
            pair_w = jnp.where(lo_mask, w_lo, w_hi)                        # (TB, 2V)
            slab = vis_ref[:, 2 * V * p:2 * V * (p + 1)].astype(jnp.float32)
            acc = acc + slab * pair_w
        # Fold the two V-lane halves once (XLU roll by half the row length).
        acc = acc + pltpu.roll(acc, shift=V, axis=1)
        out_ref[...] = acc[:, :V]
    else:
        # Generic per-region path (e.g. when V is already a multiple of 128).
        acc = jnp.zeros((tb, V), dtype=jnp.float32)
        for r in range(R):                                                 # static unroll
            slab = vis_ref[:, r * V:(r + 1) * V].astype(jnp.float32)
            acc = acc + slab * wgt[:, r:r + 1]
        out_ref[...] = acc


def _round_up(x, m):
    return (x + m - 1) // m * m


@functools.partial(jax.jit, static_argnames=("batch_tile",))
def matching_attention(vis_input, embed_input, w1_vis, w1_emb, b1, w2, b2,
                       *, batch_tile=512):
    B, R, V = vis_input.shape
    E = embed_input.shape[1]
    assert batch_tile % 8 == 0, "batch_tile must be a multiple of 8 (sublane tile)"

    # Guarantee >= 2 grid steps whenever the batch allows it (v7x has two
    # TensorCores and the "parallel" grid axis is how they both get work),
    # while amortizing the ~0.35 us per-step overhead with a tall tile.
    tb = max(8, min(batch_tile, _round_up(-(-B // 2), 8)))
    b_pad = _round_up(B, tb)

    # Lane-dense bf16 visual slab: (B, R, V) -> (B, R*V) is a free contiguous
    # reshape; bf16 halves the dominant HBM stream.
    vis_flat = vis_input.reshape(B, R * V).astype(jnp.bfloat16)
    emb = embed_input.astype(jnp.float32)
    if b_pad != B:
        vis_flat = jnp.pad(vis_flat, ((0, b_pad - B), (0, 0)))
        emb = jnp.pad(emb, ((0, b_pad - B), (0, 0)))

    # Exact composition of Linear(V+E->M) . Linear(M->1): no nonlinearity sits
    # between them, ReLU comes after the second one.  The visual part is
    # block-expanded so a single (TB, R*V) @ (R*V, R) matmul yields all R
    # region scores lane-major; the embed part collapses to a row vector + a
    # scalar bias.
    w2f = w2.reshape(-1, 1).astype(jnp.float32)                    # (M, 1)
    wv = jnp.dot(w1_vis.astype(jnp.float32), w2f)                  # (V, 1)
    eye_r = jnp.eye(R, dtype=jnp.float32)                          # (R, R)
    wv_big = (eye_r[:, None, :] * wv[None, :, 0:1]).reshape(R * V, R)
    wv_big = wv_big.astype(jnp.bfloat16)                           # bf16 MXU operand

    we_row = jnp.dot(w1_emb.astype(jnp.float32), w2f).reshape(1, E)        # (1, E)
    c = (jnp.dot(b1.reshape(1, -1).astype(jnp.float32), w2f)
         + b2.reshape(1, 1).astype(jnp.float32))                           # (1, 1)

    kernel = functools.partial(matching_attention_kernel, regions=R, visual_dim=V)

    out = pl.pallas_call(
        kernel,
        out_shape=jax.ShapeDtypeStruct((b_pad, V), jnp.float32),
        grid=(b_pad // tb,),
        in_specs=[
            pl.BlockSpec((tb, R * V), lambda i: (i, 0)),   # bf16 visual slab (batch tile)
            pl.BlockSpec((tb, E), lambda i: (i, 0)),       # f32 embedding (batch tile)
            pl.BlockSpec((R * V, R), lambda i: (0, 0)),    # composed visual score weight (bf16)
            pl.BlockSpec((1, E), lambda i: (0, 0)),        # composed embed score weight
            pl.BlockSpec((1, 1), lambda i: (0, 0)),        # composed score bias
        ],
        out_specs=pl.BlockSpec((tb, V), lambda i: (i, 0)),
        compiler_params=pltpu.CompilerParams(
            dimension_semantics=("parallel",),        # shard batch tiles across cores
            vmem_limit_bytes=32 * 1024 * 1024,        # explicit; v5e default is only 16 MiB
        ),
    )(vis_flat, emb, wv_big, we_row, c)

    return out[:B]


def matching_attention_ref(vis_input, embed_input, w1_vis, w1_emb, b1, w2, b2):
    """Pure-JAX reference mirroring the PyTorch forward (sequential linears)."""
    B, R, V = vis_input.shape
    emb = jnp.broadcast_to(embed_input[:, None, :], (B, R, embed_input.shape[1]))
    x = jnp.concatenate([vis_input, emb], axis=2)                 # (B, 36, V+E)
    w1 = jnp.concatenate([w1_vis, w1_emb], axis=0)                # (V+E, M)
    h = x @ w1 + b1                                               # (B, 36, M)
    score = h @ w2 + b2                                           # (B, 36, 1)
    score = jnp.maximum(score, 0.0)
    w = jax.nn.softmax(score, axis=1)                             # (B, 36, 1)
    return jnp.sum(vis_input * w, axis=1)                         # (B, V)


if __name__ == "__main__":
    # Small, module-consistent shapes: 36 regions is hard-coded by the forward.
    B = 20             # deliberately not a multiple of the batch tile -> tail padding
    REGIONS = 36
    VISUAL_DIM = 64
    EMBED_DIM = 32
    MATCHATTN_DIM = 32
    BATCH_TILE = 8     # small tile for the smoke test -> grid of 3 steps

    key = jax.random.PRNGKey(0)
    k_vis, k_emb, k_w1, k_b1, k_w2, k_b2 = jax.random.split(key, 6)

    vis_input = jax.random.normal(k_vis, (B, REGIONS, VISUAL_DIM), dtype=jnp.float32)
    embed_input = jax.random.normal(k_emb, (B, EMBED_DIM), dtype=jnp.float32)

    # PyTorch Linear stores W as (out, in); we keep the (in, out) transpose so
    # the kernel does x @ W directly.
    in_dim = VISUAL_DIM + EMBED_DIM
    w1_full = jax.random.normal(k_w1, (in_dim, MATCHATTN_DIM), dtype=jnp.float32) * 0.05
    w1_vis = w1_full[:VISUAL_DIM, :]                      # (V, M)
    w1_emb = w1_full[VISUAL_DIM:, :]                      # (E, M)
    b1 = jax.random.normal(k_b1, (1, MATCHATTN_DIM), dtype=jnp.float32) * 0.05
    w2 = jax.random.normal(k_w2, (MATCHATTN_DIM, 1), dtype=jnp.float32) * 0.05
    b2 = jax.random.normal(k_b2, (1, 1), dtype=jnp.float32) * 0.05

    out = matching_attention(vis_input, embed_input, w1_vis, w1_emb, b1, w2, b2,
                             batch_tile=BATCH_TILE)
    out = jax.block_until_ready(out)

    ref = matching_attention_ref(vis_input, embed_input, w1_vis, w1_emb, b1, w2, b2)
    assert out.shape == (B, VISUAL_DIM)
    # Tolerance covers the bf16 visual stream / bf16 composed score weight and
    # the approximate (EUP) softmax reciprocal; a real bug would be off by O(1).
    assert jnp.allclose(out, ref, atol=1e-2, rtol=1e-2), "mismatch vs reference"

    print("KERNEL_OK")
</pallas_src>

<mosaic_0001>
module attributes {stable_mosaic.version = 11 : i64} {
  func.func @matching_attention_kernel(%arg0: i32, %arg1: memref<8x2304xbf16, #tpu.memory_space<vmem>>, %arg2: memref<8x32xf32, #tpu.memory_space<vmem>>, %arg3: memref<2304x36xbf16, #tpu.memory_space<vmem>>, %arg4: memref<1x32xf32, #tpu.memory_space<vmem>>, %arg5: memref<1x1xf32, #tpu.memory_space<vmem>>, %arg6: memref<8x64xf32, #tpu.memory_space<vmem>>) attributes {dimension_semantics = [#tpu.dimension_semantics<parallel>], iteration_bounds = array<i64: 3>, scalar_prefetch = 0 : i64, scratch_operands = 0 : i64, tpu.core_type = #tpu.core_type<tc>, window_params = [{transform_indices = @transform_0, window_bounds = array<i64: 8, 2304>}, {transform_indices = @transform_1, window_bounds = array<i64: 8, 32>}, {pipeline_mode = #tpu.pipeline_mode<synchronous>, transform_indices = @transform_2, window_bounds = array<i64: 2304, 36>}, {pipeline_mode = #tpu.pipeline_mode<synchronous>, transform_indices = @transform_3, window_bounds = array<i64: 1, 32>}, {pipeline_mode = #tpu.pipeline_mode<synchronous>, transform_indices = @transform_4, window_bounds = array<i64: 1, 1>}, {transform_indices = @transform_5, window_bounds = array<i64: 8, 64>}]} {
    %c0 = arith.constant 0 : index
    %c0_0 = arith.constant 0 : index
    %0 = vector.load %arg1[%c0, %c0_0] : memref<8x2304xbf16, #tpu.memory_space<vmem>>, vector<8x2304xbf16>
    %c0_1 = arith.constant 0 : index
    %c0_2 = arith.constant 0 : index
    %1 = vector.load %arg3[%c0_1, %c0_2] : memref<2304x36xbf16, #tpu.memory_space<vmem>>, vector<2304x36xbf16>
    %cst = arith.constant dense<0.000000e+00> : vector<8x36xf32>
    %2 = tpu.matmul %0, %1, %cst {dimension_numbers = #tpu.dot_dimension_numbers<[1], [0], [0], [1], [0, 0, 1, 1], [], []>} : vector<8x2304xbf16>, vector<2304x36xbf16>, vector<8x36xf32> -> vector<8x36xf32>
    %c0_3 = arith.constant 0 : index
    %c0_4 = arith.constant 0 : index
    %3 = vector.load %arg2[%c0_3, %c0_4] : memref<8x32xf32, #tpu.memory_space<vmem>>, vector<8x32xf32>
    %c0_5 = arith.constant 0 : index
    %c0_6 = arith.constant 0 : index
    %4 = vector.load %arg4[%c0_5, %c0_6] : memref<1x32xf32, #tpu.memory_space<vmem>>, vector<1x32xf32>
    %5 = vector.broadcast %4 : vector<1x32xf32> to vector<8x32xf32>
    %6 = arith.mulf %3, %5 : vector<8x32xf32>
    %cst_7 = arith.constant dense<0.000000e+00> : vector<8xf32>
    %7 = vector.multi_reduction <add>, %6, %cst_7 [1] : vector<8x32xf32> to vector<8xf32>
    %8 = vector.shape_cast %7 : vector<8xf32> to vector<8x1xf32>
    %c0_8 = arith.constant 0 : index
    %c0_9 = arith.constant 0 : index
    %9 = vector.load %arg5[%c0_8, %c0_9] : memref<1x1xf32, #tpu.memory_space<vmem>>, vector<1x1xf32>
    %10 = vector.broadcast %9 : vector<1x1xf32> to vector<8x1xf32>
    %11 = arith.addf %8, %10 : vector<8x1xf32>
    %12 = vector.broadcast %11 : vector<8x1xf32> to vector<8x36xf32>
    %13 = arith.addf %2, %12 : vector<8x36xf32>
    %cst_10 = arith.constant 0.000000e+00 : f32
    %14 = vector.broadcast %cst_10 : f32 to vector<8x36xf32>
    %15 = arith.maximumf %13, %14 : vector<8x36xf32>
    %cst_11 = arith.constant dense<0xFF800000> : vector<8xf32>
    %16 = vector.multi_reduction <maximumf>, %15, %cst_11 [1] : vector<8x36xf32> to vector<8xf32>
    %17 = vector.shape_cast %16 : vector<8xf32> to vector<8x1xf32>
    %18 = vector.broadcast %17 : vector<8x1xf32> to vector<8x36xf32>
    %19 = arith.subf %15, %18 : vector<8x36xf32>
    %20 = math.exp %19 : vector<8x36xf32>
    %cst_12 = arith.constant dense<0.000000e+00> : vector<8xf32>
    %21 = vector.multi_reduction <add>, %20, %cst_12 [1] : vector<8x36xf32> to vector<8xf32>
    %22 = vector.shape_cast %21 : vector<8xf32> to vector<8x1xf32>
    %23 = tpu.reciprocal %22 {approx = true} : vector<8x1xf32> -> vector<8x1xf32>
    %24 = vector.broadcast %23 : vector<8x1xf32> to vector<8x36xf32>
    %25 = arith.mulf %20, %24 : vector<8x36xf32>
    %26 = tpu.iota {dimensions = array<i32: 1>} : vector<8x128xi32>
    %c64_i32 = arith.constant 64 : i32
    %27 = vector.broadcast %c64_i32 : i32 to vector<8x128xi32>
    %28 = arith.cmpi slt, %26, %27 : vector<8x128xi32>
    %cst_13 = arith.constant 0.000000e+00 : f32
    %29 = vector.broadcast %cst_13 : f32 to vector<8x128xf32>
    %30 = vector.extract_strided_slice %25 {offsets = [0, 0], sizes = [8, 1], strides = [1, 1]} : vector<8x36xf32> to vector<8x1xf32>
    %31 = vector.extract_strided_slice %25 {offsets = [0, 1], sizes = [8, 1], strides = [1, 1]} : vector<8x36xf32> to vector<8x1xf32>
    %32 = vector.shape_cast %30 : vector<8x1xf32> to vector<8x1xf32>
    %33 = vector.broadcast %32 : vector<8x1xf32> to vector<8x128xf32>
    %34 = vector.shape_cast %31 : vector<8x1xf32> to vector<8x1xf32>
    %35 = vector.broadcast %34 : vector<8x1xf32> to vector<8x128xf32>
    %36 = arith.select %28, %33, %35 : vector<8x128xi1>, vector<8x128xf32>
    %c0_14 = arith.constant 0 : index
    %c0_15 = arith.constant 0 : index
    %37 = vector.load %arg1[%c0_14, %c0_15] : memref<8x2304xbf16, #tpu.memory_space<vmem>>, vector<8x128xbf16>
    %38 = arith.extf %37 : vector<8x128xbf16> to vector<8x128xf32>
    %39 = arith.mulf %38, %36 : vector<8x128xf32>
    %40 = arith.addf %29, %39 : vector<8x128xf32>
    %41 = vector.extract_strided_slice %25 {offsets = [0, 2], sizes = [8, 1], strides = [1, 1]} : vector<8x36xf32> to vector<8x1xf32>
    %42 = vector.extract_strided_slice %25 {offsets = [0, 3], sizes = [8, 1], strides = [1, 1]} : vector<8x36xf32> to vector<8x1xf32>
    %43 = vector.shape_cast %41 : vector<8x1xf32> to vector<8x1xf32>
    %44 = vector.broadcast %43 : vector<8x1xf32> to vector<8x128xf32>
    %45 = vector.shape_cast %42 : vector<8x1xf32> to vector<8x1xf32>
    %46 = vector.broadcast %45 : vector<8x1xf32> to vector<8x128xf32>
    %47 = arith.select %28, %44, %46 : vector<8x128xi1>, vector<8x128xf32>
    %c0_16 = arith.constant 0 : index
    %c128 = arith.constant 128 : index
    %48 = vector.load %arg1[%c0_16, %c128] : memref<8x2304xbf16, #tpu.memory_space<vmem>>, vector<8x128xbf16>
    %49 = arith.extf %48 : vector<8x128xbf16> to vector<8x128xf32>
    %50 = arith.mulf %49, %47 : vector<8x128xf32>
    %51 = arith.addf %40, %50 : vector<8x128xf32>
    %52 = vector.extract_strided_slice %25 {offsets = [0, 4], sizes = [8, 1], strides = [1, 1]} : vector<8x36xf32> to vector<8x1xf32>
    %53 = vector.extract_strided_slice %25 {offsets = [0, 5], sizes = [8, 1], strides = [1, 1]} : vector<8x36xf32> to vector<8x1xf32>
    %54 = vector.shape_cast %52 : vector<8x1xf32> to vector<8x1xf32>
    %55 = vector.broadcast %54 : vector<8x1xf32> to vector<8x128xf32>
    %56 = vector.shape_cast %53 : vector<8x1xf32> to vector<8x1xf32>
    %57 = vector.broadcast %56 : vector<8x1xf32> to vector<8x128xf32>
    %58 = arith.select %28, %55, %57 : vector<8x128xi1>, vector<8x128xf32>
    %c0_17 = arith.constant 0 : index
    %c256 = arith.constant 256 : index
    %59 = vector.load %arg1[%c0_17, %c256] : memref<8x2304xbf16, #tpu.memory_space<vmem>>, vector<8x128xbf16>
    %60 = arith.extf %59 : vector<8x128xbf16> to vector<8x128xf32>
    %61 = arith.mulf %60, %58 : vector<8x128xf32>
    %62 = arith.addf %51, %61 : vector<8x128xf32>
    %63 = vector.extract_strided_slice %25 {offsets = [0, 6], sizes = [8, 1], strides = [1, 1]} : vector<8x36xf32> to vector<8x1xf32>
    %64 = vector.extract_strided_slice %25 {offsets = [0, 7], sizes = [8, 1], strides = [1, 1]} : vector<8x36xf32> to vector<8x1xf32>
    %65 = vector.shape_cast %63 : vector<8x1xf32> to vector<8x1xf32>
    %66 = vector.broadcast %65 : vector<8x1xf32> to vector<8x128xf32>
    %67 = vector.shape_cast %64 : vector<8x1xf32> to vector<8x1xf32>
    %68 = vector.broadcast %67 : vector<8x1xf32> to vector<8x128xf32>
    %69 = arith.select %28, %66, %68 : vector<8x128xi1>, vector<8x128xf32>
    %c0_18 = arith.constant 0 : index
    %c384 = arith.constant 384 : index
    %70 = vector.load %arg1[%c0_18, %c384] : memref<8x2304xbf16, #tpu.memory_space<vmem>>, vector<8x128xbf16>
    %71 = arith.extf %70 : vector<8x128xbf16> to vector<8x128xf32>
    %72 = arith.mulf %71, %69 : vector<8x128xf32>
    %73 = arith.addf %62, %72 : vector<8x128xf32>
    %74 = vector.extract_strided_slice %25 {offsets = [0, 8], sizes = [8, 1], strides = [1, 1]} : vector<8x36xf32> to vector<8x1xf32>
    %75 = vector.extract_strided_slice %25 {offsets = [0, 9], sizes = [8, 1], strides = [1, 1]} : vector<8x36xf32> to vector<8x1xf32>
    %76 = vector.shape_cast %74 : vector<8x1xf32> to vector<8x1xf32>
    %77 = vector.broadcast %76 : vector<8x1xf32> to vector<8x128xf32>
    %78 = vector.shape_cast %75 : vector<8x1xf32> to vector<8x1xf32>
    %79 = vector.broadcast %78 : vector<8x1xf32> to vector<8x128xf32>
    %80 = arith.select %28, %77, %79 : vector<8x128xi1>, vector<8x128xf32>
    %c0_19 = arith.constant 0 : index
    %c512 = arith.constant 512 : index
    %81 = vector.load %arg1[%c0_19, %c512] : memref<8x2304xbf16, #tpu.memory_space<vmem>>, vector<8x128xbf16>
    %82 = arith.extf %81 : vector<8x128xbf16> to vector<8x128xf32>
    %83 = arith.mulf %82, %80 : vector<8x128xf32>
    %84 = arith.addf %73, %83 : vector<8x128xf32>
    %85 = vector.extract_strided_slice %25 {offsets = [0, 10], sizes = [8, 1], strides = [1, 1]} : vector<8x36xf32> to vector<8x1xf32>
    %86 = vector.extract_strided_slice %25 {offsets = [0, 11], sizes = [8, 1], strides = [1, 1]} : vector<8x36xf32> to vector<8x1xf32>
    %87 = vector.shape_cast %85 : vector<8x1xf32> to vector<8x1xf32>
    %88 = vector.broadcast %87 : vector<8x1xf32> to vector<8x128xf32>
    %89 = vector.shape_cast %86 : vector<8x1xf32> to vector<8x1xf32>
    %90 = vector.broadcast %89 : vector<8x1xf32> to vector<8x128xf32>
    %91 = arith.select %28, %88, %90 : vector<8x128xi1>, vector<8x128xf32>
    %c0_20 = arith.constant 0 : index
    %c640 = arith.constant 640 : index
    %92 = vector.load %arg1[%c0_20, %c640] : memref<8x2304xbf16, #tpu.memory_space<vmem>>, vector<8x128xbf16>
    %93 = arith.extf %92 : vector<8x128xbf16> to vector<8x128xf32>
    %94 = arith.mulf %93, %91 : vector<8x128xf32>
    %95 = arith.addf %84, %94 : vector<8x128xf32>
    %96 = vector.extract_strided_slice %25 {offsets = [0, 12], sizes = [8, 1], strides = [1, 1]} : vector<8x36xf32> to vector<8x1xf32>
    %97 = vector.extract_strided_slice %25 {offsets = [0, 13], sizes = [8, 1], strides = [1, 1]} : vector<8x36xf32> to vector<8x1xf32>
    %98 = vector.shape_cast %96 : vector<8x1xf32> to vector<8x1xf32>
    %99 = vector.broadcast %98 : vector<8x1xf32> to vector<8x128xf32>
    %100 = vector.shape_cast %97 : vector<8x1xf32> to vector<8x1xf32>
    %101 = vector.broadcast %100 : vector<8x1xf32> to vector<8x128xf32>
    %102 = arith.select %28, %99, %101 : vector<8x128xi1>, vector<8x128xf32>
    %c0_21 = arith.constant 0 : index
    %c768 = arith.constant 768 : index
    %103 = vector.load %arg1[%c0_21, %c768] : memref<8x2304xbf16, #tpu.memory_space<vmem>>, vector<8x128xbf16>
    %104 = arith.extf %103 : vector<8x128xbf16> to vector<8x128xf32>
    %105 = arith.mulf %104, %102 : vector<8x128xf32>
    %106 = arith.addf %95, %105 : vector<8x128xf32>
    %107 = vector.extract_strided_slice %25 {offsets = [0, 14], sizes = [8, 1], strides = [1, 1]} : vector<8x36xf32> to vector<8x1xf32>
    %108 = vector.extract_strided_slice %25 {offsets = [0, 15], sizes = [8, 1], strides = [1, 1]} : vector<8x36xf32> to vector<8x1xf32>
    %109 = vector.shape_cast %107 : vector<8x1xf32> to vector<8x1xf32>
    %110 = vector.broadcast %109 : vector<8x1xf32> to vector<8x128xf32>
    %111 = vector.shape_cast %108 : vector<8x1xf32> to vector<8x1xf32>
    %112 = vector.broadcast %111 : vector<8x1xf32> to vector<8x128xf32>
    %113 = arith.select %28, %110, %112 : vector<8x128xi1>, vector<8x128xf32>
    %c0_22 = arith.constant 0 : index
    %c896 = arith.constant 896 : index
    %114 = vector.load %arg1[%c0_22, %c896] : memref<8x2304xbf16, #tpu.memory_space<vmem>>, vector<8x128xbf16>
    %115 = arith.extf %114 : vector<8x128xbf16> to vector<8x128xf32>
    %116 = arith.mulf %115, %113 : vector<8x128xf32>
    %117 = arith.addf %106, %116 : vector<8x128xf32>
    %118 = vector.extract_strided_slice %25 {offsets = [0, 16], sizes = [8, 1], strides = [1, 1]} : vector<8x36xf32> to vector<8x1xf32>
    %119 = vector.extract_strided_slice %25 {offsets = [0, 17], sizes = [8, 1], strides = [1, 1]} : vector<8x36xf32> to vector<8x1xf32>
    %120 = vector.shape_cast %118 : vector<8x1xf32> to vector<8x1xf32>
    %121 = vector.broadcast %120 : vector<8x1xf32> to vector<8x128xf32>
    %122 = vector.shape_cast %119 : vector<8x1xf32> to vector<8x1xf32>
    %123 = vector.broadcast %122 : vector<8x1xf32> to vector<8x128xf32>
    %124 = arith.select %28, %121, %123 : vector<8x128xi1>, vector<8x128xf32>
    %c0_23 = arith.constant 0 : index
    %c1024 = arith.constant 1024 : index
    %125 = vector.load %arg1[%c0_23, %c1024] : memref<8x2304xbf16, #tpu.memory_space<vmem>>, vector<8x128xbf16>
    %126 = arith.extf %125 : vector<8x128xbf16> to vector<8x128xf32>
    %127 = arith.mulf %126, %124 : vector<8x128xf32>
    %128 = arith.addf %117, %127 : vector<8x128xf32>
    %129 = vector.extract_strided_slice %25 {offsets = [0, 18], sizes = [8, 1], strides = [1, 1]} : vector<8x36xf32> to vector<8x1xf32>
    %130 = vector.extract_strided_slice %25 {offsets = [0, 19], sizes = [8, 1], strides = [1, 1]} : vector<8x36xf32> to vector<8x1xf32>
    %131 = vector.shape_cast %129 : vector<8x1xf32> to vector<8x1xf32>
    %132 = vector.broadcast %131 : vector<8x1xf32> to vector<8x128xf32>
    %133 = vector.shape_cast %130 : vector<8x1xf32> to vector<8x1xf32>
    %134 = vector.broadcast %133 : vector<8x1xf32> to vector<8x128xf32>
    %135 = arith.select %28, %132, %134 : vector<8x128xi1>, vector<8x128xf32>
    %c0_24 = arith.constant 0 : index
    %c1152 = arith.constant 1152 : index
    %136 = vector.load %arg1[%c0_24, %c1152] : memref<8x2304xbf16, #tpu.memory_space<vmem>>, vector<8x128xbf16>
    %137 = arith.extf %136 : vector<8x128xbf16> to vector<8x128xf32>
    %138 = arith.mulf %137, %135 : vector<8x128xf32>
    %139 = arith.addf %128, %138 : vector<8x128xf32>
    %140 = vector.extract_strided_slice %25 {offsets = [0, 20], sizes = [8, 1], strides = [1, 1]} : vector<8x36xf32> to vector<8x1xf32>
    %141 = vector.extract_strided_slice %25 {offsets = [0, 21], sizes = [8, 1], strides = [1, 1]} : vector<8x36xf32> to vector<8x1xf32>
    %142 = vector.shape_cast %140 : vector<8x1xf32> to vector<8x1xf32>
    %143 = vector.broadcast %142 : vector<8x1xf32> to vector<8x128xf32>
    %144 = vector.shape_cast %141 : vector<8x1xf32> to vector<8x1xf32>
    %145 = vector.broadcast %144 : vector<8x1xf32> to vector<8x128xf32>
    %146 = arith.select %28, %143, %145 : vector<8x128xi1>, vector<8x128xf32>
    %c0_25 = arith.constant 0 : index
    %c1280 = arith.constant 1280 : index
    %147 = vector.load %arg1[%c0_25, %c1280] : memref<8x2304xbf16, #tpu.memory_space<vmem>>, vector<8x128xbf16>
    %148 = arith.extf %147 : vector<8x128xbf16> to vector<8x128xf32>
    %149 = arith.mulf %148, %146 : vector<8x128xf32>
    %150 = arith.addf %139, %149 : vector<8x128xf32>
    %151 = vector.extract_strided_slice %25 {offsets = [0, 22], sizes = [8, 1], strides = [1, 1]} : vector<8x36xf32> to vector<8x1xf32>
    %152 = vector.extract_strided_slice %25 {offsets = [0, 23], sizes = [8, 1], strides = [1, 1]} : vector<8x36xf32> to vector<8x1xf32>
    %153 = vector.shape_cast %151 : vector<8x1xf32> to vector<8x1xf32>
    %154 = vector.broadcast %153 : vector<8x1xf32> to vector<8x128xf32>
    %155 = vector.shape_cast %152 : vector<8x1xf32> to vector<8x1xf32>
    %156 = vector.broadcast %155 : vector<8x1xf32> to vector<8x128xf32>
    %157 = arith.select %28, %154, %156 : vector<8x128xi1>, vector<8x128xf32>
    %c0_26 = arith.constant 0 : index
    %c1408 = arith.constant 1408 : index
    %158 = vector.load %arg1[%c0_26, %c1408] : memref<8x2304xbf16, #tpu.memory_space<vmem>>, vector<8x128xbf16>
    %159 = arith.extf %158 : vector<8x128xbf16> to vector<8x128xf32>
    %160 = arith.mulf %159, %157 : vector<8x128xf32>
    %161 = arith.addf %150, %160 : vector<8x128xf32>
    %162 = vector.extract_strided_slice %25 {offsets = [0, 24], sizes = [8, 1], strides = [1, 1]} : vector<8x36xf32> to vector<8x1xf32>
    %163 = vector.extract_strided_slice %25 {offsets = [0, 25], sizes = [8, 1], strides = [1, 1]} : vector<8x36xf32> to vector<8x1xf32>
    %164 = vector.shape_cast %162 : vector<8x1xf32> to vector<8x1xf32>
    %165 = vector.broadcast %164 : vector<8x1xf32> to vector<8x128xf32>
    %166 = vector.shape_cast %163 : vector<8x1xf32> to vector<8x1xf32>
    %167 = vector.broadcast %166 : vector<8x1xf32> to vector<8x128xf32>
    %168 = arith.select %28, %165, %167 : vector<8x128xi1>, vector<8x128xf32>
    %c0_27 = arith.constant 0 : index
    %c1536 = arith.constant 1536 : index
    %169 = vector.load %arg1[%c0_27, %c1536] : memref<8x2304xbf16, #tpu.memory_space<vmem>>, vector<8x128xbf16>
    %170 = arith.extf %169 : vector<8x128xbf16> to vector<8x128xf32>
    %171 = arith.mulf %170, %168 : vector<8x128xf32>
    %172 = arith.addf %161, %171 : vector<8x128xf32>
    %173 = vector.extract_strided_slice %25 {offsets = [0, 26], sizes = [8, 1], strides = [1, 1]} : vector<8x36xf32> to vector<8x1xf32>
    %174 = vector.extract_strided_slice %25 {offsets = [0, 27], sizes = [8, 1], strides = [1, 1]} : vector<8x36xf32> to vector<8x1xf32>
    %175 = vector.shape_cast %173 : vector<8x1xf32> to vector<8x1xf32>
    %176 = vector.broadcast %175 : vector<8x1xf32> to vector<8x128xf32>
    %177 = vector.shape_cast %174 : vector<8x1xf32> to vector<8x1xf32>
    %178 = vector.broadcast %177 : vector<8x1xf32> to vector<8x128xf32>
    %179 = arith.select %28, %176, %178 : vector<8x128xi1>, vector<8x128xf32>
    %c0_28 = arith.constant 0 : index
    %c1664 = arith.constant 1664 : index
    %180 = vector.load %arg1[%c0_28, %c1664] : memref<8x2304xbf16, #tpu.memory_space<vmem>>, vector<8x128xbf16>
    %181 = arith.extf %180 : vector<8x128xbf16> to vector<8x128xf32>
    %182 = arith.mulf %181, %179 : vector<8x128xf32>
    %183 = arith.addf %172, %182 : vector<8x128xf32>
    %184 = vector.extract_strided_slice %25 {offsets = [0, 28], sizes = [8, 1], strides = [1, 1]} : vector<8x36xf32> to vector<8x1xf32>
    %185 = vector.extract_strided_slice %25 {offsets = [0, 29], sizes = [8, 1], strides = [1, 1]} : vector<8x36xf32> to vector<8x1xf32>
    %186 = vector.shape_cast %184 : vector<8x1xf32> to vector<8x1xf32>
    %187 = vector.broadcast %186 : vector<8x1xf32> to vector<8x128xf32>
    %188 = vector.shape_cast %185 : vector<8x1xf32> to vector<8x1xf32>
    %189 = vector.broadcast %188 : vector<8x1xf32> to vector<8x128xf32>
    %190 = arith.select %28, %187, %189 : vector<8x128xi1>, vector<8x128xf32>
    %c0_29 = arith.constant 0 : index
    %c1792 = arith.constant 1792 : index
    %191 = vector.load %arg1[%c0_29, %c1792] : memref<8x2304xbf16, #tpu.memory_space<vmem>>, vector<8x128xbf16>
    %192 = arith.extf %191 : vector<8x128xbf16> to vector<8x128xf32>
    %193 = arith.mulf %192, %190 : vector<8x128xf32>
    %194 = arith.addf %183, %193 : vector<8x128xf32>
    %195 = vector.extract_strided_slice %25 {offsets = [0, 30], sizes = [8, 1], strides = [1, 1]} : vector<8x36xf32> to vector<8x1xf32>
    %196 = vector.extract_strided_slice %25 {offsets = [0, 31], sizes = [8, 1], strides = [1, 1]} : vector<8x36xf32> to vector<8x1xf32>
    %197 = vector.shape_cast %195 : vector<8x1xf32> to vector<8x1xf32>
    %198 = vector.broadcast %197 : vector<8x1xf32> to vector<8x128xf32>
    %199 = vector.shape_cast %196 : vector<8x1xf32> to vector<8x1xf32>
    %200 = vector.broadcast %199 : vector<8x1xf32> to vector<8x128xf32>
    %201 = arith.select %28, %198, %200 : vector<8x128xi1>, vector<8x128xf32>
    %c0_30 = arith.constant 0 : index
    %c1920 = arith.constant 1920 : index
    %202 = vector.load %arg1[%c0_30, %c1920] : memref<8x2304xbf16, #tpu.memory_space<vmem>>, vector<8x128xbf16>
    %203 = arith.extf %202 : vector<8x128xbf16> to vector<8x128xf32>
    %204 = arith.mulf %203, %201 : vector<8x128xf32>
    %205 = arith.addf %194, %204 : vector<8x128xf32>
    %206 = vector.extract_strided_slice %25 {offsets = [0, 32], sizes = [8, 1], strides = [1, 1]} : vector<8x36xf32> to vector<8x1xf32>
    %207 = vector.extract_strided_slice %25 {offsets = [0, 33], sizes = [8, 1], strides = [1, 1]} : vector<8x36xf32> to vector<8x1xf32>
    %208 = vector.shape_cast %206 : vector<8x1xf32> to vector<8x1xf32>
    %209 = vector.broadcast %208 : vector<8x1xf32> to vector<8x128xf32>
    %210 = vector.shape_cast %207 : vector<8x1xf32> to vector<8x1xf32>
    %211 = vector.broadcast %210 : vector<8x1xf32> to vector<8x128xf32>
    %212 = arith.select %28, %209, %211 : vector<8x128xi1>, vector<8x128xf32>
    %c0_31 = arith.constant 0 : index
    %c2048 = arith.constant 2048 : index
    %213 = vector.load %arg1[%c0_31, %c2048] : memref<8x2304xbf16, #tpu.memory_space<vmem>>, vector<8x128xbf16>
    %214 = arith.extf %213 : vector<8x128xbf16> to vector<8x128xf32>
    %215 = arith.mulf %214, %212 : vector<8x128xf32>
    %216 = arith.addf %205, %215 : vector<8x128xf32>
    %217 = vector.extract_strided_slice %25 {offsets = [0, 34], sizes = [8, 1], strides = [1, 1]} : vector<8x36xf32> to vector<8x1xf32>
    %218 = vector.extract_strided_slice %25 {offsets = [0, 35], sizes = [8, 1], strides = [1, 1]} : vector<8x36xf32> to vector<8x1xf32>
    %219 = vector.shape_cast %217 : vector<8x1xf32> to vector<8x1xf32>
    %220 = vector.broadcast %219 : vector<8x1xf32> to vector<8x128xf32>
    %221 = vector.shape_cast %218 : vector<8x1xf32> to vector<8x1xf32>
    %222 = vector.broadcast %221 : vector<8x1xf32> to vector<8x128xf32>
    %223 = arith.select %28, %220, %222 : vector<8x128xi1>, vector<8x128xf32>
    %c0_32 = arith.constant 0 : index
    %c2176 = arith.constant 2176 : index
    %224 = vector.load %arg1[%c0_32, %c2176] : memref<8x2304xbf16, #tpu.memory_space<vmem>>, vector<8x128xbf16>
    %225 = arith.extf %224 : vector<8x128xbf16> to vector<8x128xf32>
    %226 = arith.mulf %225, %223 : vector<8x128xf32>
    %227 = arith.addf %216, %226 : vector<8x128xf32>
    %c64_i32_33 = arith.constant 64 : i32
    %228 = tpu.dynamic_rotate %227 by %c64_i32_33 dim 1 : vector<8x128xf32>, i32 -> vector<8x128xf32>
    %229 = arith.addf %227, %228 : vector<8x128xf32>
    %230 = vector.extract_strided_slice %229 {offsets = [0, 0], sizes = [8, 64], strides = [1, 1]} : vector<8x128xf32> to vector<8x64xf32>
    %c0_34 = arith.constant 0 : index
    %c0_35 = arith.constant 0 : index
    %231 = vector.load %arg6[%c0_34, %c0_35] : memref<8x64xf32, #tpu.memory_space<vmem>>, vector<8x64xf32>
    tpu.vector_store %arg6[%c0_34, %c0_35], %230 {strides = array<i32>} : memref<8x64xf32, #tpu.memory_space<vmem>>, vector<8x64xf32>,
    return
  }
  func.func @transform_0(%arg0: i32) -> (i32, i32) {
    %c0_i32 = arith.constant 0 : i32
    %c0_i32_0 = arith.constant 0 : i32
    return %arg0, %c0_i32 : i32, i32
  }
  func.func @transform_1(%arg0: i32) -> (i32, i32) {
    %c0_i32 = arith.constant 0 : i32
    %c0_i32_0 = arith.constant 0 : i32
    return %arg0, %c0_i32 : i32, i32
  }
  func.func @transform_2(%arg0: i32) -> (i32, i32) {
    %c0_i32 = arith.constant 0 : i32
    %c0_i32_0 = arith.constant 0 : i32
    %c0_i32_1 = arith.constant 0 : i32
    return %c0_i32, %c0_i32_0 : i32, i32
  }
  func.func @transform_3(%arg0: i32) -> (i32, i32) {
    %c0_i32 = arith.constant 0 : i32
    %c0_i32_0 = arith.constant 0 : i32
    %c0_i32_1 = arith.constant 0 : i32
    return %c0_i32, %c0_i32_0 : i32, i32
  }
  func.func @transform_4(%arg0: i32) -> (i32, i32) {
    %c0_i32 = arith.constant 0 : i32
    %c0_i32_0 = arith.constant 0 : i32
    %c0_i32_1 = arith.constant 0 : i32
    return %c0_i32, %c0_i32_0 : i32, i32
  }
  func.func @transform_5(%arg0: i32) -> (i32, i32) {
    %c0_i32 = arith.constant 0 : i32
    %c0_i32_0 = arith.constant 0 : i32
    return %arg0, %c0_i32 : i32, i32
  }
}

</mosaic_0001>

<bundles_post_ra>
// kernel: matching_attention.1
= control target key start
LH: loop header
LB: loop body
LE: loop exit
PB: predicated region body
PF: predicated region fallthrough
CT: control target
= control target key end

     0   :  { %s3607_s0 = inlined_call_operand.vmem [shape: bf16[24,2304], index: 0, kind: input, shape index: {}]   ;;  %s3608_s1 = inlined_call_operand.vmem [shape: f32[24,32], index: 1, kind: input, shape index: {}]   ;;  %s3609_s2 = inlined_call_operand.vmem [shape: bf16[2304,36], index: 2, kind: input, shape index: {}]   ;;  %s3610_s3 = inlined_call_operand.vmem [shape: f32[1,32], index: 3, kind: input, shape index: {}]   ;;  %s3611_s4 = inlined_call_operand.<no memory space> [shape: f32[1,1], index: 4, kind: input, shape index: {}]   ;;  %s3612_s5 = inlined_call_operand.hbm [shape: f32[24,64], index: 5, kind: output, shape index: {}]  }
   0x1   :  { %v10_v0 = vstv %s3611_s4 }
   0x2   :  { %11 = vst [vmem:[#allocation2] sm:$0x1] %v10_v0 }
   0x3   :  { %12 = vsyncpa [#allocation4], 0 }
   0x4   :  { %14 = vsyncpa [#allocation4 + $0x1], 0  ;;  %s2981_s20 = smov 0   ;;  %s2983_s21 = smov 0  }
   0x5   :  { %s2985_s22 = smov 0   ;;  %s2987_s23 = smov 0  }
   0x6 LB: > { %s3002_s4 = sadd.s32 4294967295, %s2908_s23   ;;  %s2194_s24 = sadd.s32 4294967294, %s2908_s23   ;;  %s2908_s23 = sphi %s2987_s23, %s3618_s23   ;;  %s2904_s22 = sphi %s2985_s22, %s3617_s22   ;;  %s2900_s21 = sphi %s2983_s21, %s3616_s21   ;;  %s2896_s20 = sphi %s2981_s20, %s3615_s20  }
   0x7   : > { %s3006_s25 = sadd.s32 1, %s2908_s23   ;;  %s142_s26 = sadd.s32 1, %s2904_s22 }
   0x8   : > { %s139_s27 = ssub.s32 %s2908_s23, %s3006_s25  ;;  %p152_p0 = scmp.ne.s32.totalorder %s2904_s22, %s2900_s21 }
   0x9   : > { %p140_p1 = scmp.eq.s32.totalorder %s139_s27, 0  ;;  %p153_p2 = scmp.eq.s32.totalorder %s3002_s4, 2 }
   0xa   : > { %p158_p3 = scmp.ne.s32.totalorder %s2900_s21, %s2896_s20  ;;  %p159_p4 = scmp.eq.s32.totalorder %s2194_s24, 2 }
   0xb   : > { %s3017_s28 = scalar_select %p140_p1, %s2904_s22, %s142_s26  }
   0xc   : > { %p3019_p5 = por %p153_p2, %p152_p0  ;;  %p3023_p6 = por %p159_p4, %p158_p3 }
   0xd   : > { %p2197_p7 = scmp.ge.s32.totalorder %s2908_s23, 1  ;;  %p201_p8 = scmp.lt.s32.totalorder %s2908_s23, 4 }
   0xf   : > { %p202_p9 = pnand %p2197_p7, %p201_p8 }
  0x10   : > { %p233_p10 = scmp.lt.s32.totalorder (!%p202_p9), %s3002_s4, 2  ;;  %s230_s16 = sand.u32 (!%p202_p9), 1, %s2900_s21  }
  0x11   : > { %205 = sbr.rel (%p202_p9) target bundleno = 1080 (0x438), region = 40  ;;  %s2110_s7 = scalar_lea.sflag (!%p202_p9), [#allocation4], %s230_s16 }
  0x12   : > { %s2947_s9 = smov (!%p202_p9), [#allocation3]  }
  0x13   : > { %s2852_s11 = sshll.u32 (!%p202_p9), %s2947_s9, 4  ;;  %s2853_s11 = int_to_ptr.vmem [resolvable:$false] %s2852_s11 }
  0x16   : > { %v2682_v1 = vld [vmem:[%s3609_s2 + $0x78] sm:$0xff]   ;;  %s3040_s12 = scalar_select %p233_p10, %s3002_s4, 2  ;;  %v2686_v5 = vld [vmem:[%s3609_s2 + $0x70] sm:$0xff]   ;;  %v2201_v10 = vld [vmem:[%s3610_s3] ss:$0 sm:$0xff]  ;;  %vm549_vm0 = vcmask 261120  }
  0x17   : > { %v2683_v2 = vld [vmem:[%s3609_s2 + $0x38] sm:$0xff]   ;;  %2369 = vmatprep.subr.bf16.mxu0 %v2682_v1  ;;  %v2687_v6 = vld [vmem:[%s3609_s2 + $0x30] sm:$0xff]   ;;  %v2690_v12 = vld [vmem:[%s3609_s2 + $0x68] sm:$0xff]   ;;  %v2910_v29 = vmov 0   ;;  %vm1854_vm1 = vcmask 293888   ;;  %vm2107_vm3 = vcmask 523264  }
  0x18   : > { %v2684_v3 = vld [vmem:[%s3609_s2 + $0xf8] sm:$0xff]   ;;  %2370 = vmatpush3.bf16.msra.mxu0 %v2683_v2  ;;  %s2200_s17 = sshll.u32 %s3040_s12, 3  ;;  %v2688_v7 = vld [vmem:[%s3609_s2 + $0xf0] sm:$0xff]   ;;  %v2691_v13 = vld [vmem:[%s3609_s2 + $0x28] sm:$0xff]   ;;  %s2567_s10 = smul.u32 72, %s3040_s12  ;;  %2644 = vset.pattern.permute.xlu0 %v2910_v29 }
  0x19   : > { %v2685_v4 = vld [vmem:[%s3609_s2 + $0xb8] sm:$0xff]   ;;  %2391 = vmatprep.subr.bf16.mxu1 %v2684_v3  ;;  %s241_s27 = scalar_lea.vmem %s3608_s1, %s2200_s17  ;;  %2371 = vmatprep.subr.bf16.mxu0 %v2686_v5  ;;  %v2689_v8 = vld [vmem:[%s3609_s2 + $0xb0] sm:$0xff]   ;;  %v2692_v15 = vld [vmem:[%s3609_s2 + $0xe8] sm:$0xff]   ;;  %s2198_s17 = sshll.u32 %s230_s16, 3 }
  0x1a   : > { %2392 = vmatpush3.bf16.msra.mxu1 %v2685_v4  ;;  %v540_v9 = vld [vmem:[%s241_s27] sm:$0xff]  ;;  %v2693_v16 = vld [vmem:[%s3609_s2 + $0xa8] sm:$0xff]   ;;  %v2698_v21 = vld [vmem:[%s3609_s2 + $0x58] sm:$0xff]   ;;  %2645 = vset.pattern.permute.xlu1 %v2910_v29  ;;  %s3125_s26 = scalar_lea.vmem %s3607_s0, %s2567_s10  ;;  %s2366_s12 = sshll.u32 %s3002_s4, 7 }
  0x1b   : > { %2393 = vmatprep.subr.bf16.mxu1 %v2688_v7  ;;  %v548_v11 = vmul.f32 %v2201_v10, %v540_v9  ;;  %v2694_v17 = vld [vmem:[%s3609_s2 + $0x60] sm:$0xff]   ;;  %v2699_v22 = vld [vmem:[%s3609_s2 + $0x18] sm:$0xff]   ;;  %v2702_v25 = vld [vmem:[%s3609_s2 + $0x50] sm:$0xff]   ;;  %s232_s18 = scalar_lea.vmem [#allocation3], %s2198_s17  ;;  %s2121_s6 = scalar_lea.hbm %s3612_s5, %s2366_s12 }
  0x1c   : > { %2372 = vmatpush3.bf16.msra.mxu0 %v2687_v6  ;;  %v2695_v18 = vld [vmem:[%s3609_s2 + $0x20] sm:$0xff]   ;;  %v2700_v23 = vld [vmem:[%s3609_s2 + $0xd8] sm:$0xff]   ;;  %v2703_v26 = vld [vmem:[%s3609_s2 + $0x10] sm:$0xff]   ;;  %s2123_s19 = sshll.u32 %s232_s18, 4  ;;  %s2854_s4 = scalar_lea.vmem %s2853_s11, 256  ;;  %s2124_s19 = int_to_ptr.vmem [resolvable:$true] %s2123_s19 }
  0x1d   : > { %v550_v14 = vsel %vm549_vm0, %v548_v11, 0.0  ;;  %2373 = vmatprep.subr.bf16.mxu0 %v2690_v12  ;;  %v2696_v19 = vld [vmem:[%s3609_s2 + $0xe0] sm:$0xff]   ;;  %v2701_v24 = vld [vmem:[%s3609_s2 + $0x98] sm:$0xff]   ;;  %v2704_v27 = vld [vmem:[%s3609_s2 + $0xd0] sm:$0xff]   ;;  %s2848_s8 = scalar_lea.vmem %s2124_s19, 128  ;;  %p2855_p0 = scmp.lt.s32.totalorder %s2124_s19, %s2853_s11 }
  0x1e   : > { %2394 = vmatpush3.bf16.msra.mxu1 %v2689_v8  ;;  %551 = vadd.xlane.f32.xlu0 %v550_v14  ;;  %v2697_v20 = vld [vmem:[%s3609_s2 + $0xa0] sm:$0xff]   ;;  %v2705_v28 = vld [vmem:[%s3609_s2 + $0x90] sm:$0xff]   ;;  %v2706_v30 = vld [vmem:[%s3609_s2 + $0x48] sm:$0xff]   ;;  %p2849_p11 = scmp.ne.s32.totalorder %s2124_s19, %s2848_s8  ;;  %p2856_p1 = scmp.lt.s32.totalorder %s2854_s4, %s2848_s8 }
  0x1f   : > { %2395 = vmatprep.subr.bf16.mxu1 %v2692_v15  ;;  %v2707_v31 = vld [vmem:[%s3609_s2 + $0x8] sm:$0xff]   ;;  %v2710_v34 = vld [vmem:[%s3609_s2 + $0x40] sm:$0xff]   ;;  %v2716_v41 = vld [vmem:[%s3609_s2 + $0x178] sm:$0xff]  }
  0x20   : > { %2374 = vmatpush3.bf16.msra.mxu0 %v2691_v13  ;;  %v2708_v32 = vld [vmem:[%s3609_s2 + $0xc8] sm:$0xff]   ;;  %v2711_v35 = vld [vmem:[%s3609_s2] sm:$0xff]   ;;  %v2717_v42 = vld [vmem:[%s3609_s2 + $0x138] sm:$0xff]   ;;  %p2850_p12 = pnand %p2849_p11, %p3019_p5  ;;  %p2857_p2 = por %p2856_p1, %p2855_p0 }
  0x21   : > { %2375 = vmatprep.subr.bf16.mxu0 %v2694_v17  ;;  %v2709_v33 = vld [vmem:[%s3609_s2 + $0x88] sm:$0xff]   ;;  %v2712_v36 = vld [vmem:[%s3609_s2 + $0xc0] sm:$0xff]   ;;  %v2720_v46 = vld [vmem:[%s3609_s2 + $0x1f8] sm:$0xff]  }
  0x22   : > { %2396 = vmatpush3.bf16.msra.mxu1 %v2693_v16  ;;  %v243_v37 = vld [vmem:[%s3125_s26] sm:$0xff]  ;;  %v244_v43 = vld [vmem:[%s3125_s26 + $0x8] sm:$0xff]  ;;  %v2721_v47 = vld [vmem:[%s3609_s2 + $0x1b8] sm:$0xff]   ;;  %p2851_p13 = pneg %p2850_p12 }
  0x23   : > { %2397 = vmatprep.subr.bf16.mxu1 %v2696_v19  ;;  %v2203_v38 = vcombine.low %v243_v37, %v243_v37  ;;  %v2204_v39 = vcombine.high %v243_v37, %v243_v37  ;;  %v2715_v40 = vld [vmem:[%s3609_s2 + $0x80] sm:$0xff]   ;;  %v2205_v44 = vcombine.low %v244_v43, %v244_v43  ;;  %v2206_v45 = vcombine.high %v244_v43, %v244_v43  ;;  %v2722_v48 = vld [vmem:[%s3609_s2 + $0x170] sm:$0xff]   ;;  %v2726_v52 = vld [vmem:[%s3609_s2 + $0x168] sm:$0xff]  }
  0x24   : > { %2376 = vmatpush3.bf16.msra.mxu0 %v2695_v18  ;;  %v2723_v49 = vld [vmem:[%s3609_s2 + $0x130] sm:$0xff]   ;;  %v2727_v53 = vld [vmem:[%s3609_s2 + $0x128] sm:$0xff]   ;;  %v2730_v56 = vld [vmem:[%s3609_s2 + $0x160] sm:$0xff]   ;;  %p2858_p3 = pnand %p2857_p2, %p2851_p13 }
  0x25   : > { %2377 = vmatprep.subr.bf16.mxu0 %v2698_v21  ;;  %1525 = vmatprep.mubr.bf16.mxu0 %v2204_v39  ;;  %v2724_v50 = vld [vmem:[%s3609_s2 + $0x1f0] sm:$0xff]   ;;  %v2728_v54 = vld [vmem:[%s3609_s2 + $0x1e8] sm:$0xff]   ;;  %v2731_v57 = vld [vmem:[%s3609_s2 + $0x120] sm:$0xff]  }
  0x26   : > { %2398 = vmatpush3.bf16.msra.mxu1 %v2697_v20  ;;  %1565 = vmatprep.mubr.bf16.mxu1 %v2206_v45  ;;  %v2725_v51 = vld [vmem:[%s3609_s2 + $0x1b0] sm:$0xff]   ;;  %v2729_v55 = vld [vmem:[%s3609_s2 + $0x1a8] sm:$0xff]   ;;  %v2732_v58 = vld [vmem:[%s3609_s2 + $0x1e0] sm:$0xff]  }
  0x27   : > { %2399 = vmatprep.subr.bf16.mxu1 %v2700_v23  ;;  %v2733_v59 = vld [vmem:[%s3609_s2 + $0x1a0] sm:$0xff]   ;;  %v2734_v60 = vld [vmem:[%s3609_s2 + $0x158] sm:$0xff]   ;;  %v2738_v0 = vld [vmem:[%s3609_s2 + $0x150] sm:$0xff]  }
  0x28   : > { %2378 = vmatpush3.bf16.msra.mxu0 %v2699_v22  ;;  %v2735_v61 = vld [vmem:[%s3609_s2 + $0x118] sm:$0xff]   ;;  %v2739_v1 = vld [vmem:[%s3609_s2 + $0x110] sm:$0xff]   ;;  %v2742_v4 = vld [vmem:[%s3609_s2 + $0x148] sm:$0xff]  }
  0x29   : > { %2379 = vmatprep.subr.bf16.mxu0 %v2702_v25  ;;  %v2736_v62 = vld [vmem:[%s3609_s2 + $0x1d8] sm:$0xff]   ;;  %v2740_v2 = vld [vmem:[%s3609_s2 + $0x1d0] sm:$0xff]   ;;  %v2743_v5 = vld [vmem:[%s3609_s2 + $0x108] sm:$0xff]  }
  0x2a   : > { %2400 = vmatpush3.bf16.msra.mxu1 %v2701_v24  ;;  %v2737_v63 = vld [vmem:[%s3609_s2 + $0x198] sm:$0xff]   ;;  %v2741_v3 = vld [vmem:[%s3609_s2 + $0x190] sm:$0xff]   ;;  %v2744_v6 = vld [vmem:[%s3609_s2 + $0x1c8] sm:$0xff]  }
  0x2b   : > { %2401 = vmatprep.subr.bf16.mxu1 %v2704_v27  ;;  %v2745_v7 = vld [vmem:[%s3609_s2 + $0x188] sm:$0xff]   ;;  %v2746_v8 = vld [vmem:[%s3609_s2 + $0x140] sm:$0xff]   ;;  %v245_v11 = vld [vmem:[%s3125_s26 + $0x10] sm:$0xff] }
  0x2c   : > { %2380 = vmatpush3.bf16.msra.mxu0 %v2703_v26  ;;  %v2747_v9 = vld [vmem:[%s3609_s2 + $0x100] sm:$0xff]   ;;  %v2207_v12 = vcombine.low %v245_v11, %v245_v11  ;;  %v2208_v13 = vcombine.high %v245_v11, %v245_v11  ;;  %v2752_v15 = vld [vmem:[%s3609_s2 + $0x278] sm:$0xff]   ;;  %v2758_v22 = vld [vmem:[%s3609_s2 + $0x270] sm:$0xff]  }
  0x2d   : > { %2381 = vmatprep.subr.bf16.mxu0 %v2706_v30  ;;  %v2748_v10 = vld [vmem:[%s3609_s2 + $0x1c0] sm:$0xff]   ;;  %v2753_v16 = vld [vmem:[%s3609_s2 + $0x238] sm:$0xff]   ;;  %v2759_v23 = vld [vmem:[%s3609_s2 + $0x230] sm:$0xff]  }
  0x2e   : > { %2402 = vmatpush3.bf16.msra.mxu1 %v2705_v28  ;;  %v2751_v14 = vld [vmem:[%s3609_s2 + $0x180] sm:$0xff]   ;;  %v246_v17 = vld [vmem:[%s3125_s26 + $0x18] sm:$0xff]  ;;  %v2760_v24 = vld [vmem:[%s3609_s2 + $0x2f0] sm:$0xff]  }
  0x2f   : > { %2403 = vmatprep.subr.bf16.mxu1 %v2708_v32  ;;  %v2209_v18 = vcombine.low %v246_v17, %v246_v17  ;;  %v2210_v19 = vcombine.high %v246_v17, %v246_v17  ;;  %v2756_v20 = vld [vmem:[%s3609_s2 + $0x2f8] sm:$0xff]   ;;  %v2761_v25 = vld [vmem:[%s3609_s2 + $0x2b0] sm:$0xff]   ;;  %v2762_v26 = vld [vmem:[%s3609_s2 + $0x268] sm:$0xff]  }
  0x30   : > { %2382 = vmatpush3.bf16.msra.mxu0 %v2707_v31  ;;  %v2757_v21 = vld [vmem:[%s3609_s2 + $0x2b8] sm:$0xff]   ;;  %v2763_v27 = vld [vmem:[%s3609_s2 + $0x228] sm:$0xff]   ;;  %v2766_v30 = vld [vmem:[%s3609_s2 + $0x260] sm:$0xff]  }
  0x31   : > { %2383 = vmatprep.subr.bf16.mxu0 %v2710_v34  ;;  %v2764_v28 = vld [vmem:[%s3609_s2 + $0x2e8] sm:$0xff]   ;;  %v2767_v31 = vld [vmem:[%s3609_s2 + $0x220] sm:$0xff]   ;;  %v2770_v34 = vld [vmem:[%s3609_s2 + $0x258] sm:$0xff]  }
  0x32   : > { %2404 = vmatpush3.bf16.msra.mxu1 %v2709_v33  ;;  %v2765_v29 = vld [vmem:[%s3609_s2 + $0x2a8] sm:$0xff]   ;;  %v2768_v32 = vld [vmem:[%s3609_s2 + $0x2e0] sm:$0xff]   ;;  %v2773_v37 = vld [vmem:[%s3609_s2 + $0x298] sm:$0xff]  }
  0x33   : > { %2405 = vmatprep.subr.bf16.mxu1 %v2712_v36  ;;  %v2769_v33 = vld [vmem:[%s3609_s2 + $0x2a0] sm:$0xff]   ;;  %v2772_v36 = vld [vmem:[%s3609_s2 + $0x2d8] sm:$0xff]   ;;  %v2775_v39 = vld [vmem:[%s3609_s2 + $0x210] sm:$0xff]  }
  0x34   : > { %2384 = vmatpush3.bf16.msra.mxu0 %v2711_v35  ;;  %v2771_v35 = vld [vmem:[%s3609_s2 + $0x218] sm:$0xff]   ;;  %v2779_v43 = vld [vmem:[%s3609_s2 + $0x208] sm:$0xff]  }
  0x35   : > { %2413 = vmatprep.subr.bf16.mxu0 %v2716_v41  ;;  %v2777_v41 = vld [vmem:[%s3609_s2 + $0x290] sm:$0xff]   ;;  %v2781_v45 = vld [vmem:[%s3609_s2 + $0x288] sm:$0xff]   ;;  %v2809_v11 = vld [vmem:[%s3609_s2 + $0x398] sm:$0xff]  }
  0x36   : > { %2406 = vmatpush3.bf16.msra.mxu1 %v2715_v40  ;;  %v2776_v40 = vld [vmem:[%s3609_s2 + $0x2d0] sm:$0xff]   ;;  %v2815_v17 = vld [vmem:[%s3609_s2 + $0x308] sm:$0xff]  }
  0x37   : > { %1526 = vmatmul.mubr.bf16.vlgmr.msra.gmra.mxu0 %v2203_v38  ;;  %2435 = vmatprep.subr.bf16.mxu1 %v2720_v46  ;;  %v2774_v38 = vld [vmem:[%s3609_s2 + $0x250] sm:$0xff]   ;;  %v2782_v46 = vld [vmem:[%s3609_s2 + $0x240] sm:$0xff]  }
  0x38   : > { %2414 = vmatpush3.bf16.msra.mxu0 %v2717_v42  ;;  %1605 = vmatprep.mubr.bf16.mxu0 %v2208_v13  ;;  %v2778_v42 = vld [vmem:[%s3609_s2 + $0x248] sm:$0xff]   ;;  %v2811_v13 = vld [vmem:[%s3609_s2 + $0x310] sm:$0xff]  }
  0x39   : > { %1566 = vmatmul.mubr.bf16.vlgmr.msra.gmra.mxu1 %v2205_v44  ;;  %2415 = vmatprep.subr.bf16.mxu0 %v2722_v48  ;;  %v2780_v44 = vld [vmem:[%s3609_s2 + $0x2c8] sm:$0xff]   ;;  %v2784_v48 = vld [vmem:[%s3609_s2 + $0x2c0] sm:$0xff]  }
  0x3a   : > { %2436 = vmatpush3.bf16.msra.mxu1 %v2721_v47  ;;  %1645 = vmatprep.mubr.bf16.mxu1 %v2210_v19  ;;  %v2783_v47 = vld [vmem:[%s3609_s2 + $0x200] sm:$0xff]   ;;  %v2817_v19 = vld [vmem:[%s3609_s2 + $0x388] sm:$0xff]  }
  0x3b   : > { %2437 = vmatprep.subr.bf16.mxu1 %v2724_v50 }
  0x3c   : > { %2416 = vmatpush3.bf16.msra.mxu0 %v2723_v49  ;;  %v247_v49 = vld [vmem:[%s3125_s26 + $0x20] sm:$0xff] }
  0x3d   : > { %2417 = vmatprep.subr.bf16.mxu0 %v2726_v52  ;;  %v2211_v50 = vcombine.low %v247_v49, %v247_v49  ;;  %v2787_v52 = vld [vmem:[%s3609_s2 + $0x280] sm:$0xff]  }
  0x3e   : > { %2438 = vmatpush3.bf16.msra.mxu1 %v2725_v51  ;;  %v2212_v51 = vcombine.high %v247_v49, %v247_v49  ;;  %v2840_v49 = vld [vmem:[%s3609_s2 + $0x440] sm:$0xff]  }
  0x3f   : > { %2439 = vmatprep.subr.bf16.mxu1 %v2728_v54  ;;  %v248_v54 = vld [vmem:[%s3125_s26 + $0x28] sm:$0xff] }
  0x40   : > { %2418 = vmatpush3.bf16.msra.mxu0 %v2727_v53  ;;  %v2788_v53 = vld [vmem:[%s3609_s2 + $0x378] sm:$0xff]  }
  0x41   : > { %2419 = vmatprep.subr.bf16.mxu0 %v2730_v56  ;;  %v2214_v56 = vcombine.high %v248_v54, %v248_v54 }
  0x42   : > { %2440 = vmatpush3.bf16.msra.mxu1 %v2729_v55  ;;  %v2213_v55 = vcombine.low %v248_v54, %v248_v54 }
  0x43   : > { %2441 = vmatprep.subr.bf16.mxu1 %v2732_v58  ;;  %v2792_v58 = vld [vmem:[%s3609_s2 + $0x3f8] sm:$0xff]  }
  0x44   : > { %2420 = vmatpush3.bf16.msra.mxu0 %v2731_v57  ;;  %v2791_v57 = vld [vmem:[%s3609_s2 + $0x338] sm:$0xff]  }
  0x45   : > { %2421 = vmatprep.subr.bf16.mxu0 %v2734_v60  ;;  %v2794_v60 = vld [vmem:[%s3609_s2 + $0x370] sm:$0xff]  }
  0x46   : > { %2442 = vmatpush3.bf16.msra.mxu1 %v2733_v59  ;;  %v2793_v59 = vld [vmem:[%s3609_s2 + $0x3b8] sm:$0xff]  }
  0x47   : > { %2443 = vmatprep.subr.bf16.mxu1 %v2736_v62  ;;  %v2796_v62 = vld [vmem:[%s3609_s2 + $0x3f0] sm:$0xff]  }
  0x48   : > { %2422 = vmatpush3.bf16.msra.mxu0 %v2735_v61  ;;  %v2795_v61 = vld [vmem:[%s3609_s2 + $0x330] sm:$0xff]  }
  0x49   : > { %2423 = vmatprep.subr.bf16.mxu0 %v2738_v0  ;;  %v2798_v0 = vld [vmem:[%s3609_s2 + $0x368] sm:$0xff]  }
  0x4a   : > { %2444 = vmatpush3.bf16.msra.mxu1 %v2737_v63  ;;  %v2797_v63 = vld [vmem:[%s3609_s2 + $0x3b0] sm:$0xff]  }
  0x4b   : > { %2445 = vmatprep.subr.bf16.mxu1 %v2740_v2  ;;  %v2800_v2 = vld [vmem:[%s3609_s2 + $0x3e8] sm:$0xff]  }
  0x4c   : > { %2424 = vmatpush3.bf16.msra.mxu0 %v2739_v1  ;;  %v2799_v1 = vld [vmem:[%s3609_s2 + $0x328] sm:$0xff]  }
  0x4d   : > { %2425 = vmatprep.subr.bf16.mxu0 %v2742_v4  ;;  %v2802_v4 = vld [vmem:[%s3609_s2 + $0x360] sm:$0xff]  }
  0x4e   : > { %2446 = vmatpush3.bf16.msra.mxu1 %v2741_v3  ;;  %v2801_v3 = vld [vmem:[%s3609_s2 + $0x3a8] sm:$0xff]  }
  0x4f   : > { %2447 = vmatprep.subr.bf16.mxu1 %v2744_v6  ;;  %v2804_v6 = vld [vmem:[%s3609_s2 + $0x3e0] sm:$0xff]  }
  0x50   : > { %2426 = vmatpush3.bf16.msra.mxu0 %v2743_v5  ;;  %v2803_v5 = vld [vmem:[%s3609_s2 + $0x320] sm:$0xff]  }
  0x51   : > { %2427 = vmatprep.subr.bf16.mxu0 %v2746_v8  ;;  %v2806_v8 = vld [vmem:[%s3609_s2 + $0x358] sm:$0xff]  }
  0x52   : > { %2448 = vmatpush3.bf16.msra.mxu1 %v2745_v7  ;;  %v2805_v7 = vld [vmem:[%s3609_s2 + $0x3a0] sm:$0xff]  }
  0x53   : > { %2449 = vmatprep.subr.bf16.mxu1 %v2748_v10  ;;  %v2808_v10 = vld [vmem:[%s3609_s2 + $0x3d8] sm:$0xff]  }
  0x54   : > { %2428 = vmatpush3.bf16.msra.mxu0 %v2747_v9  ;;  %v2807_v9 = vld [vmem:[%s3609_s2 + $0x318] sm:$0xff]  }
  0x55   : > { %2457 = vmatprep.subr.bf16.mxu0 %v2752_v15  ;;  %v2813_v15 = vld [vmem:[%s3609_s2 + $0x390] sm:$0xff]  }
  0x56   : > { %2450 = vmatpush3.bf16.msra.mxu1 %v2751_v14  ;;  %v2812_v14 = vld [vmem:[%s3609_s2 + $0x3d0] sm:$0xff]  }
  0x57   : > { %1606 = vmatmul.mubr.bf16.vlgmr.msra.gmra.mxu0 %v2207_v12  ;;  %2479 = vmatprep.subr.bf16.mxu1 %v2756_v20  ;;  %v2810_v12 = vld [vmem:[%s3609_s2 + $0x350] sm:$0xff]   ;;  %v2818_v20 = vld [vmem:[%s3609_s2 + $0x340] sm:$0xff]  }
  0x58   : > { %2458 = vmatpush3.bf16.msra.mxu0 %v2753_v16  ;;  %1685 = vmatprep.mubr.bf16.mxu0 %v2212_v51  ;;  %v2814_v16 = vld [vmem:[%s3609_s2 + $0x348] sm:$0xff]  }
  0x59   : > { %1646 = vmatmul.mubr.bf16.vlgmr.msra.gmra.mxu1 %v2209_v18  ;;  %2459 = vmatprep.subr.bf16.mxu0 %v2758_v22  ;;  %v2816_v18 = vld [vmem:[%s3609_s2 + $0x3c8] sm:$0xff]   ;;  %v2820_v22 = vld [vmem:[%s3609_s2 + $0x3c0] sm:$0xff]  }
  0x5a   : > { %2480 = vmatpush3.bf16.msra.mxu1 %v2757_v21  ;;  %1725 = vmatprep.mubr.bf16.mxu1 %v2214_v56  ;;  %v2819_v21 = vld [vmem:[%s3609_s2 + $0x300] sm:$0xff]  }
  0x5b   : > { %2481 = vmatprep.subr.bf16.mxu1 %v2760_v24 }
  0x5c   : > { %2460 = vmatpush3.bf16.msra.mxu0 %v2759_v23  ;;  %v249_v23 = vld [vmem:[%s3125_s26 + $0x30] sm:$0xff] }
  0x5d   : > { %2461 = vmatprep.subr.bf16.mxu0 %v2762_v26  ;;  %v2215_v24 = vcombine.low %v249_v23, %v249_v23  ;;  %v2823_v26 = vld [vmem:[%s3609_s2 + $0x380] sm:$0xff]  }
  0x5e   : > { %2482 = vmatpush3.bf16.msra.mxu1 %v2761_v25  ;;  %v2216_v25 = vcombine.high %v249_v23, %v249_v23 }
  0x5f   : > { %2483 = vmatprep.subr.bf16.mxu1 %v2764_v28  ;;  %v250_v28 = vld [vmem:[%s3125_s26 + $0x38] sm:$0xff] }
  0x60   : > { %2462 = vmatpush3.bf16.msra.mxu0 %v2763_v27  ;;  %v2824_v27 = vld [vmem:[%s3609_s2 + $0x478] sm:$0xff]  }
  0x61   : > { %2463 = vmatprep.subr.bf16.mxu0 %v2766_v30  ;;  %v2218_v30 = vcombine.high %v250_v28, %v250_v28 }
  0x62   : > { %2484 = vmatpush3.bf16.msra.mxu1 %v2765_v29  ;;  %v2217_v29 = vcombine.low %v250_v28, %v250_v28 }
  0x63   : > { %2485 = vmatprep.subr.bf16.mxu1 %v2768_v32  ;;  %v2828_v32 = vld [vmem:[%s3609_s2 + $0x470] sm:$0xff]  }
  0x64   : > { %2464 = vmatpush3.bf16.msra.mxu0 %v2767_v31  ;;  %v2827_v31 = vld [vmem:[%s3609_s2 + $0x438] sm:$0xff]  }
  0x65   : > { %2465 = vmatprep.subr.bf16.mxu0 %v2770_v34  ;;  %v2830_v34 = vld [vmem:[%s3609_s2 + $0x468] sm:$0xff]  }
  0x66   : > { %2486 = vmatpush3.bf16.msra.mxu1 %v2769_v33  ;;  %v2829_v33 = vld [vmem:[%s3609_s2 + $0x430] sm:$0xff]  }
  0x67   : > { %2487 = vmatprep.subr.bf16.mxu1 %v2772_v36  ;;  %v2832_v36 = vld [vmem:[%s3609_s2 + $0x460] sm:$0xff]  }
  0x68   : > { %2466 = vmatpush3.bf16.msra.mxu0 %v2771_v35  ;;  %v2831_v35 = vld [vmem:[%s3609_s2 + $0x428] sm:$0xff]  }
  0x69   : > { %2467 = vmatprep.subr.bf16.mxu0 %v2774_v38  ;;  %v2834_v38 = vld [vmem:[%s3609_s2 + $0x458] sm:$0xff]  }
  0x6a   : > { %2488 = vmatpush3.bf16.msra.mxu1 %v2773_v37  ;;  %v2833_v37 = vld [vmem:[%s3609_s2 + $0x420] sm:$0xff]  }
  0x6b   : > { %2489 = vmatprep.subr.bf16.mxu1 %v2776_v40  ;;  %v2835_v40 = vld [vmem:[%s3609_s2 + $0x418] sm:$0xff]  }
  0x6c   : > { %2468 = vmatpush3.bf16.msra.mxu0 %v2775_v39  ;;  %v2202_v39 = vld [vmem:[#allocation2] ss:$0 sm:$0xff] }
  0x6d   : > { %2469 = vmatprep.subr.bf16.mxu0 %v2778_v42  ;;  %v2836_v42 = vld [vmem:[%s3609_s2 + $0x450] sm:$0xff]  }
  0x6e   : > { %2490 = vmatpush3.bf16.msra.mxu1 %v2777_v41  ;;  %v251_v41 = vld [vmem:[%s3125_s26 + $0x40] sm:$0xff] }
  0x6f   : > { %2491 = vmatprep.subr.bf16.mxu1 %v2780_v44  ;;  %v2219_v51 = vcombine.low %v251_v41, %v251_v41 }
  0x70   : > { %2470 = vmatpush3.bf16.msra.mxu0 %v2779_v43  ;;  %v2220_v43 = vcombine.high %v251_v41, %v251_v41 }
  0x71   : > { %2471 = vmatprep.subr.bf16.mxu0 %v2782_v46  ;;  %v2837_v46 = vld [vmem:[%s3609_s2 + $0x410] sm:$0xff]  }
  0x72   : > { %2492 = vmatpush3.bf16.msra.mxu1 %v2781_v45 }
  0x73   : > { %2493 = vmatprep.subr.bf16.mxu1 %v2784_v48  ;;  %v2839_v48 = vld [vmem:[%s3609_s2 + $0x408] sm:$0xff]  }
  0x74   : > { %2472 = vmatpush3.bf16.msra.mxu0 %v2783_v47  ;;  %v2838_v47 = vld [vmem:[%s3609_s2 + $0x448] sm:$0xff]  }
  0x75   : > { %2501 = vmatprep.subr.bf16.mxu0 %v2788_v53 }
  0x76   : > { %2494 = vmatpush3.bf16.msra.mxu1 %v2787_v52 }
  0x77   : > { %1686 = vmatmul.mubr.bf16.vlgmr.msra.gmra.mxu0 %v2211_v50  ;;  %2523 = vmatprep.subr.bf16.mxu1 %v2792_v58  ;;  %v2841_v50 = vld [vmem:[%s3609_s2 + $0x400] sm:$0xff]  }
  0x78   : > { %2502 = vmatpush3.bf16.msra.mxu0 %v2791_v57  ;;  %1765 = vmatprep.mubr.bf16.mxu0 %v2216_v25 }
  0x79   : > { %1726 = vmatmul.mubr.bf16.vlgmr.msra.gmra.mxu1 %v2213_v55  ;;  %2503 = vmatprep.subr.bf16.mxu0 %v2794_v60 }
  0x7a   : > { %2524 = vmatpush3.bf16.msra.mxu1 %v2793_v59  ;;  %1805 = vmatprep.mubr.bf16.mxu1 %v2218_v30 }
  0x7b   : > { %2525 = vmatprep.subr.bf16.mxu1 %v2796_v62 }
  0x7c   : > { %2504 = vmatpush3.bf16.msra.mxu0 %v2795_v61 }
  0x7d   : > { %2505 = vmatprep.subr.bf16.mxu0 %v2798_v0 }
  0x7e   : > { %2526 = vmatpush3.bf16.msra.mxu1 %v2797_v63 }
  0x7f   : > { %2527 = vmatprep.subr.bf16.mxu1 %v2800_v2 }
  0x80   : > { %2506 = vmatpush3.bf16.msra.mxu0 %v2799_v1 }
  0x81   : > { %2507 = vmatprep.subr.bf16.mxu0 %v2802_v4 }
  0x82   : > { %2528 = vmatpush3.bf16.msra.mxu1 %v2801_v3 }
  0x83   : > { %2529 = vmatprep.subr.bf16.mxu1 %v2804_v6 }
  0x84   : > { %2508 = vmatpush3.bf16.msra.mxu0 %v2803_v5 }
  0x85   : > { %2509 = vmatprep.subr.bf16.mxu0 %v2806_v8 }
  0x86   : > { %2530 = vmatpush3.bf16.msra.mxu1 %v2805_v7 }
  0x87   : > { %2531 = vmatprep.subr.bf16.mxu1 %v2808_v10 }
  0x88   : > { %2510 = vmatpush3.bf16.msra.mxu0 %v2807_v9 }
  0x89   : > { %2511 = vmatprep.subr.bf16.mxu0 %v2810_v12 }
  0x8a   : > { %2532 = vmatpush3.bf16.msra.mxu1 %v2809_v11 }
  0x8b   : > { %2533 = vmatprep.subr.bf16.mxu1 %v2812_v14 }
  0x8c   : > { %2512 = vmatpush3.bf16.msra.mxu0 %v2811_v13 }
  0x8d   : > { %2513 = vmatprep.subr.bf16.mxu0 %v2814_v16 }
  0x8e   : > { %2534 = vmatpush3.bf16.msra.mxu1 %v2813_v15 }
  0x8f   : > { %2535 = vmatprep.subr.bf16.mxu1 %v2816_v18 }
  0x90   : > { %2514 = vmatpush3.bf16.msra.mxu0 %v2815_v17 }
  0x91   : > { %2515 = vmatprep.subr.bf16.mxu0 %v2818_v20 }
  0x92   : > { %2536 = vmatpush3.bf16.msra.mxu1 %v2817_v19 }
  0x93   : > { %2537 = vmatprep.subr.bf16.mxu1 %v2820_v22 }
  0x94   : > { %2516 = vmatpush3.bf16.msra.mxu0 %v2819_v21 }
  0x95   : > { %2545 = vmatprep.subr.bf16.mxu0 %v2824_v27 }
  0x96   : > { %2538 = vmatpush3.bf16.msra.mxu1 %v2823_v26 }
  0x97   : > { %1766 = vmatmul.mubr.bf16.vlgmr.msra.gmra.mxu0 %v2215_v24 }
  0x98   : > { %2546 = vmatpush3.bf16.msra.mxu0 %v2827_v31  ;;  %1845 = vmatprep.mubr.bf16.mxu0 %v2220_v43 }
  0x99   : > { %1806 = vmatmul.mubr.bf16.vlgmr.msra.gmra.mxu1 %v2217_v29  ;;  %2547 = vmatprep.subr.bf16.mxu0 %v2828_v32 }
  0x9c   : > { %2548 = vmatpush3.bf16.msra.mxu0 %v2829_v33 }
  0x9d   : > { %2549 = vmatprep.subr.bf16.mxu0 %v2830_v34 }
  0xa0   : > { %2550 = vmatpush3.bf16.msra.mxu0 %v2831_v35 }
  0xa1   : > { %2551 = vmatprep.subr.bf16.mxu0 %v2832_v36 }
  0xa4   : > { %2552 = vmatpush3.bf16.msra.mxu0 %v2833_v37 }
  0xa5   : > { %2553 = vmatprep.subr.bf16.mxu0 %v2834_v38 }
  0xa7   : > { %v552_v44 = vpop.xlane.xlu0 %551 }
  0xa8   : > { %v560_v45 = vadd.f32 %v2202_v39, %v552_v44  ;;  %2554 = vmatpush3.bf16.msra.mxu0 %v2835_v40 }
  0xa9   : > { %2555 = vmatprep.subr.bf16.mxu0 %v2836_v42 }
  0xaa   : > { %563 = vperm.xlu0 %2644, %v560_v45  }
  0xac   : > { %2556 = vmatpush3.bf16.msra.mxu0 %v2837_v46 }
  0xad   : > { %2557 = vmatprep.subr.bf16.mxu0 %v2838_v47 }
  0xb0   : > { %2558 = vmatpush3.bf16.msra.mxu0 %v2839_v48 }
  0xb1   : > { %2559 = vmatprep.subr.bf16.mxu0 %v2840_v49 }
  0xb4   : > { %2560 = vmatpush3.bf16.msra.mxu0 %v2841_v50  ;;  %v2911_v50 = vmov 7  }
  0xb5   : > { %2652 = vset.pattern.permute.xlu0 %v2911_v50  ;;  %v1905_v50 = vld [vmem:[%s3125_s26 + $0x8] sm:$0xff]  }
  0xb7   : > { %1846 = vmatmul.mubr.bf16.vlgmr.msra.gmra.mxu0 %v2219_v51 }
  0xf7   : > { %v2385_v52 = vpop.f32.mrf.mxu0 }
  0xf9   : > { %v2386_v53 = vpop.f32.mrf.mxu0  ;;  %v2407_v56 = vpop.f32.mrf.mxu1 }
  0xfa   : > { %v2387_v54 = vadd.f32 %v2386_v53, %v2385_v52 }
  0xfb   : > { %v2388_v55 = vpop.f32.mrf.mxu0  ;;  %v2408_v58 = vpop.f32.mrf.mxu1 }
  0xfc   : > { %v2409_v59 = vadd.f32 %v2408_v58, %v2407_v56  ;;  %v2913_v55 = vmov 1   ;;  %v2914_v56 = vmov 13   ;;  %v2916_v58 = vmov 16  }
  0xfd   : > { %v2389_v57 = vpop.f32.mrf.mxu0  ;;  %v2410_v60 = vpop.f32.mrf.mxu1 }
  0xfe   : > { %v2915_v57 = vmov 2   ;;  %v2918_v60 = vmov 19  }
  0xff   : > { %v2411_v61 = vpop.f32.mrf.mxu1 }
 0x100   : > { %v2919_v61 = vmov 4  }
 0x117   : > { %v2429_v62 = vpop.f32.mrf.mxu0 }
 0x119   : > { %v2430_v63 = vpop.f32.mrf.mxu0  ;;  %v2451_v1 = vpop.f32.mrf.mxu1 }
 0x11a   : > { %v2431_v0 = vadd.f32 %v2430_v63, %v2429_v62  ;;  %v2920_v62 = vmov 22   ;;  %v2921_v63 = vmov 5  }
 0x11b   : > { %v2432_v2 = vpop.f32.mrf.mxu0  ;;  %v2452_v3 = vpop.f32.mrf.mxu1 }
 0x11c   : > { %v2453_v5 = vadd.f32 %v2452_v3, %v2451_v1  ;;  %v2923_v1 = vmov 6   ;;  %v2924_v2 = vmov 28   ;;  %v2925_v3 = vmov 8  }
 0x11d   : > { %v2433_v4 = vpop.f32.mrf.mxu0  ;;  %v2454_v6 = vpop.f32.mrf.mxu1 }
 0x11e   : > { %v2926_v4 = vmov 31   ;;  %v2928_v6 = vmov 34  }
 0x11f   : > { %v2455_v7 = vpop.f32.mrf.mxu1 }
 0x120   : > { %v2929_v7 = vmov 11  }
 0x125   : > { %v564_v8 = vpop.permute.xlu0 %563 }
 0x126   : > { %v1528_v9 = vadd.f32 %v2387_v54, %v564_v8  ;;  %v2912_v54 = vmov 10   ;;  %v2930_v8 = vmov 12  }
 0x128   : > { %v1568_v10 = vadd.f32 %v2409_v59, %v1528_v9  ;;  %v2917_v59 = vmov 3   ;;  %v2931_v9 = vmov 35  }
 0x12a   : > { %v1608_v11 = vadd.f32 %v2431_v0, %v1568_v10  ;;  %v2922_v0 = vmov 25   ;;  %v2932_v10 = vmov 14  }
 0x12c   : > { %v1648_v12 = vadd.f32 %v2453_v5, %v1608_v11  ;;  %v2927_v5 = vmov 9   ;;  %v2933_v11 = vmov 15  }
 0x137   : > { %v2473_v13 = vpop.f32.mrf.mxu0 }
 0x139   : > { %v2474_v14 = vpop.f32.mrf.mxu0  ;;  %v2495_v15 = vpop.f32.mrf.mxu1 }
 0x13a   : > { %v2475_v29 = vadd.f32 %v2474_v14, %v2473_v13  ;;  %v2935_v13 = vmov 18   ;;  %v2936_v14 = vmov 20  }
 0x13b   : > { %v2476_v16 = vpop.f32.mrf.mxu0  ;;  %v2496_v17 = vpop.f32.mrf.mxu1 }
 0x13c   : > { %v1688_v30 = vadd.f32 %v2475_v29, %v1648_v12  ;;  %v2497_v31 = vadd.f32 %v2496_v17, %v2495_v15  ;;  %v2934_v12 = vmov 17   ;;  %v2937_v15 = vmov 21  }
 0x13d   : > { %v2477_v18 = vpop.f32.mrf.mxu0  ;;  %v2498_v19 = vpop.f32.mrf.mxu1  ;;  %v2938_v16 = vmov 23   ;;  %v2939_v17 = vmov 24  }
 0x13e   : > { %v1728_v33 = vadd.f32 %v2497_v31, %v1688_v30  ;;  %v2940_v18 = vmov 26   ;;  %v2941_v19 = vmov 27  }
 0x13f   : > { %v2499_v20 = vpop.f32.mrf.mxu1 }
 0x140   : > { %v2942_v20 = vmov 29  }
 0x157   : > { %v2517_v21 = vpop.f32.mrf.mxu0 }
 0x159   : > { %v2518_v22 = vpop.f32.mrf.mxu0  ;;  %v2539_v23 = vpop.f32.mrf.mxu1 }
 0x15a   : > { %v2519_v32 = vadd.f32 %v2518_v22, %v2517_v21  ;;  %v2943_v21 = vmov 30   ;;  %v2944_v22 = vmov 32  }
 0x15b   : > { %v2520_v24 = vpop.f32.mrf.mxu0  ;;  %v2540_v25 = vpop.f32.mrf.mxu1 }
 0x15c   : > { %v1768_v34 = vadd.f32 %v2519_v32, %v1728_v33  ;;  %v2541_v35 = vadd.f32 %v2540_v25, %v2539_v23  ;;  %v1866_v23 = vlaneseq  ;;  %v2945_v24 = vmov 33  }
 0x15d   : > { %v2521_v26 = vpop.f32.mrf.mxu0  ;;  %v2542_v27 = vpop.f32.mrf.mxu1 }
 0x15e   : > { %v1808_v38 = vadd.f32 %v2541_v35, %v1768_v34  ;;  %v3524_v25 = vand.u32 127, %v1866_v23  ;;  %v2009_v23 = vld [vmem:[%s3125_s26 + $0x28] sm:$0xff]  }
 0x15f   : > { %v2543_v28 = vpop.f32.mrf.mxu1 }
 0x160   : > { %vm1868_vm2 = vcmp.lt.s32.totalorder %v3524_v25, 64 }
 0x177   : > { %v2561_v36 = vpop.f32.mrf.mxu0 }
 0x179   : > { %v2562_v37 = vpop.f32.mrf.mxu0 }
 0x17a   : > { %v2563_v39 = vadd.f32 %v2562_v37, %v2561_v36 }
 0x17b   : > { %v2564_v40 = vpop.f32.mrf.mxu0 }
 0x17c   : > { %v1848_v41 = vadd.f32 %v2563_v39, %v1808_v38 }
 0x17d   : > { %v2565_v42 = vpop.f32.mrf.mxu0 }
 0x17e   : > { %v1853_v43 = vmax.f32 %v1848_v41, 0.0 }
 0x180   : > { %v1855_v44 = vsel %vm1854_vm1, %v1853_v43, -inf }
 0x181   : > { %1856 = vmax.xlane.f32.xlu1 %v1855_v44 }
 0x20a   : > { %v1857_v45 = vpop.xlane.xlu1 %1856 }
 0x20b   : > { %v1858_v46 = vsub.f32 %v1853_v43, %v1857_v45 }
 0x20d   : > { %v1859_v47 = vmul.f32 1.442695, %v1858_v46 }
 0x20f   : > { %2844 = vpow2.f32 %v1859_v47 }
 0x21c   : > { %v2845_v48 = vpop.eup %2844 }
 0x21d   : > { %v1861_v49 = vsel %vm1854_vm1, %v2845_v48, 0.0 }
 0x21e   : > { %1862 = vadd.xlane.f32.xlu1 %v1861_v49  ;;  %v1879_v49 = vld [vmem:[%s3125_s26] sm:$0xff]  }
 0x2a7   : > { %v1863_v51 = vpop.xlane.xlu1 %1862 }
 0x2a8   : > { %2846 = vrcp.f32 %v1863_v51  ;;  %v1893_v51 = vunpack.c.h.bf16 %v1879_v49 }
 0x2b5   : > { %v2847_v52 = vpop.eup %2846 }
 0x2b6   : > { %v3487_v53 = vmul.f32 %v2847_v52, %v2845_v48 }
 0x2b8   : > { %1914 = vperm.xlu0 %2652, %v3487_v53   ;;  %1871 = vperm.xlu1 %2645, %v3487_v53  }
 0x2bc   : > { %2655 = vset.pattern.permute.xlu0 %v2912_v54  ;;  %2646 = vset.pattern.permute.xlu1 %v2913_v55  ;;  %v1880_v54 = vunpack.c.l.bf16 %v1879_v49  ;;  %v1906_v55 = vunpack.c.l.bf16 %v1905_v50  ;;  %v2061_v49 = vld [vmem:[%s3125_s26 + $0x38] sm:$0xff]  }
 0x2bd   : > { %1936 = vperm.xlu0 %2655, %v3487_v53   ;;  %1875 = vperm.xlu1 %2646, %v3487_v53  }
 0x2c1   : > { %2658 = vset.pattern.permute.xlu0 %v2914_v56  ;;  %2647 = vset.pattern.permute.xlu1 %v2915_v57  ;;  %v1931_v57 = vld [vmem:[%s3125_s26 + $0x10] sm:$0xff]  }
 0x2c2   : > { %1953 = vperm.xlu0 %2658, %v3487_v53   ;;  %1884 = vperm.xlu1 %2647, %v3487_v53  }
 0x2c6   : > { %2661 = vset.pattern.permute.xlu0 %v2916_v58  ;;  %2648 = vset.pattern.permute.xlu1 %v2917_v59 }
 0x2c7   : > { %1975 = vperm.xlu0 %2661, %v3487_v53   ;;  %1888 = vperm.xlu1 %2648, %v3487_v53  }
 0x2cb   : > { %2664 = vset.pattern.permute.xlu0 %v2918_v60  ;;  %2649 = vset.pattern.permute.xlu1 %v2919_v61  ;;  %v1919_v60 = vunpack.c.h.bf16 %v1905_v50 }
 0x2cc   : > { %1992 = vperm.xlu0 %2664, %v3487_v53   ;;  %1897 = vperm.xlu1 %2649, %v3487_v53  }
 0x2d0   : > { %2667 = vset.pattern.permute.xlu0 %v2920_v62  ;;  %2650 = vset.pattern.permute.xlu1 %v2921_v63 }
 0x2d1   : > { %2014 = vperm.xlu0 %2667, %v3487_v53   ;;  %1901 = vperm.xlu1 %2650, %v3487_v53  }
 0x2d5   : > { %2670 = vset.pattern.permute.xlu0 %v2922_v0  ;;  %2651 = vset.pattern.permute.xlu1 %v2923_v1  ;;  %v1932_v0 = vunpack.c.l.bf16 %v1931_v57 }
 0x2d6   : > { %2031 = vperm.xlu0 %2670, %v3487_v53   ;;  %1910 = vperm.xlu1 %2651, %v3487_v53  }
 0x2da   : > { %2673 = vset.pattern.permute.xlu0 %v2924_v2  ;;  %2653 = vset.pattern.permute.xlu1 %v2925_v3  ;;  %v1957_v3 = vld [vmem:[%s3125_s26 + $0x18] sm:$0xff]  }
 0x2db   : > { %2053 = vperm.xlu0 %2673, %v3487_v53   ;;  %1923 = vperm.xlu1 %2653, %v3487_v53  }
 0x2df   : > { %2676 = vset.pattern.permute.xlu0 %v2926_v4  ;;  %2654 = vset.pattern.permute.xlu1 %v2927_v5 }
 0x2e0   : > { %2070 = vperm.xlu0 %2676, %v3487_v53   ;;  %1927 = vperm.xlu1 %2654, %v3487_v53  }
 0x2e4   : > { %2679 = vset.pattern.permute.xlu0 %v2928_v6  ;;  %2656 = vset.pattern.permute.xlu1 %v2929_v7  ;;  %v1945_v6 = vunpack.c.h.bf16 %v1931_v57  ;;  %v2087_v57 = vld [vmem:[%s3125_s26 + $0x40] sm:$0xff]  }
 0x2e5   : > { %2092 = vperm.xlu0 %2679, %v3487_v53   ;;  %1940 = vperm.xlu1 %2656, %v3487_v53  }
 0x2e9   : > { %2657 = vset.pattern.permute.xlu1 %v2930_v8  ;;  %2681 = vset.pattern.permute.xlu0 %v2931_v9 }
 0x2ea   : > { %1949 = vperm.xlu1 %2657, %v3487_v53  }
 0x2ee   : > { %2659 = vset.pattern.permute.xlu1 %v2932_v10 }
 0x2ef   : > { %1962 = vperm.xlu1 %2659, %v3487_v53  }
 0x2f3   : > { %2660 = vset.pattern.permute.xlu1 %v2933_v11  ;;  %v1958_v11 = vunpack.c.l.bf16 %v1957_v3 }
 0x2f4   : > { %1966 = vperm.xlu1 %2660, %v3487_v53  }
 0x2f8   : > { %2662 = vset.pattern.permute.xlu1 %v2934_v12 }
 0x2f9   : > { %1979 = vperm.xlu1 %2662, %v3487_v53  }
 0x2fd   : > { %2663 = vset.pattern.permute.xlu1 %v2935_v13  ;;  %v1983_v13 = vld [vmem:[%s3125_s26 + $0x20] sm:$0xff]  }
 0x2fe   : > { %1988 = vperm.xlu1 %2663, %v3487_v53  }
 0x302   : > { %2665 = vset.pattern.permute.xlu1 %v2936_v14 }
 0x303   : > { %2001 = vperm.xlu1 %2665, %v3487_v53  }
 0x307   : > { %2666 = vset.pattern.permute.xlu1 %v2937_v15 }
 0x308   : > { %2005 = vperm.xlu1 %2666, %v3487_v53  }
 0x30c   : > { %2668 = vset.pattern.permute.xlu1 %v2938_v16 }
 0x30d   : > { %2018 = vperm.xlu1 %2668, %v3487_v53  }
 0x311   : > { %2669 = vset.pattern.permute.xlu1 %v2939_v17  ;;  %v1971_v17 = vunpack.c.h.bf16 %v1957_v3 }
 0x312   : > { %2027 = vperm.xlu1 %2669, %v3487_v53  }
 0x316   : > { %2671 = vset.pattern.permute.xlu1 %v2940_v18 }
 0x317   : > { %2040 = vperm.xlu1 %2671, %v3487_v53  }
 0x31b   : > { %2672 = vset.pattern.permute.xlu1 %v2941_v19 }
 0x31c   : > { %2044 = vperm.xlu1 %2672, %v3487_v53  }
 0x320   : > { %2674 = vset.pattern.permute.xlu1 %v2942_v20 }
 0x321   : > { %2057 = vperm.xlu1 %2674, %v3487_v53  }
 0x325   : > { %2675 = vset.pattern.permute.xlu1 %v2943_v21  ;;  %v1984_v21 = vunpack.c.l.bf16 %v1983_v13 }
 0x326   : > { %2066 = vperm.xlu1 %2675, %v3487_v53  }
 0x32a   : > { %2677 = vset.pattern.permute.xlu1 %v2944_v22 }
 0x32b   : > { %2079 = vperm.xlu1 %2677, %v3487_v53  }
 0x32f   : > { %2678 = vset.pattern.permute.xlu1 %v2945_v24 }
 0x330   : > { %2083 = vperm.xlu1 %2678, %v3487_v53  }
 0x333   : > { %v1872_v26 = vpop.permute.xlu1 %1871  ;;  %v1915_v41 = vpop.permute.xlu0 %1914 }
 0x334   : > { %2680 = vset.pattern.permute.xlu1 %v2931_v9 }
 0x335   : > { %2096 = vperm.xlu1 %2680, %v3487_v53  }
 0x338   : > { %v1876_v27 = vpop.permute.xlu1 %1875  ;;  %v1937_v43 = vpop.permute.xlu0 %1936 }
 0x339   : > { %v1878_v28 = vsel %vm1868_vm2, %v1872_v26, %v1876_v27 }
 0x33a   : > { %v1881_v62 = vmul.f32 %v1880_v54, %v1878_v28  ;;  %v1997_v28 = vunpack.c.h.bf16 %v1983_v13 }
 0x33d   : > { %v1885_v29 = vpop.permute.xlu1 %1884  ;;  %v1954_v46 = vpop.permute.xlu0 %1953 }
 0x342   : > { %v1889_v30 = vpop.permute.xlu1 %1888  ;;  %v1976_v48 = vpop.permute.xlu0 %1975 }
 0x343   : > { %v1891_v52 = vsel %vm1868_vm2, %v1885_v29, %v1889_v30 }
 0x344   : > { %v1894_v58 = vmul.f32 %v1893_v51, %v1891_v52 }
 0x346   : > { %v1895_v4 = vadd.f32 %v1894_v58, %v1881_v62 }
 0x347   : > { %v1898_v31 = vpop.permute.xlu1 %1897  ;;  %v1993_v59 = vpop.permute.xlu0 %1992 }
 0x34c   : > { %v1902_v32 = vpop.permute.xlu1 %1901  ;;  %v2015_v8 = vpop.permute.xlu0 %2014 }
 0x34d   : > { %v1904_v56 = vsel %vm1868_vm2, %v1898_v31, %v1902_v32 }
 0x34e   : > { %v1907_v63 = vmul.f32 %v1906_v55, %v1904_v56  ;;  %v2062_v55 = vunpack.c.l.bf16 %v2061_v49 }
 0x350   : > { %v1908_v9 = vadd.f32 %v1907_v63, %v1895_v4 }
 0x351   : > { %v1911_v33 = vpop.permute.xlu1 %1910  ;;  %v2032_v24 = vpop.permute.xlu0 %2031 }
 0x352   : > { %v1917_v61 = vsel %vm1868_vm2, %v1911_v33, %v1915_v41  ;;  %v2010_v33 = vunpack.c.l.bf16 %v2009_v23 }
 0x353   : > { %v1920_v5 = vmul.f32 %v1919_v60, %v1917_v61  ;;  %v2075_v61 = vunpack.c.h.bf16 %v2061_v49 }
 0x355   : > { %v1921_v15 = vadd.f32 %v1920_v5, %v1908_v9 }
 0x356   : > { %v1924_v34 = vpop.permute.xlu1 %1923  ;;  %v2054_v41 = vpop.permute.xlu0 %2053 }
 0x35b   : > { %v1928_v35 = vpop.permute.xlu1 %1927  ;;  %v2071_v58 = vpop.permute.xlu0 %2070 }
 0x35c   : > { %v1930_v2 = vsel %vm1868_vm2, %v1924_v34, %v1928_v35  ;;  %v2035_v35 = vld [vmem:[%s3125_s26 + $0x30] sm:$0xff]   ;;  %s2946_s26 = smov 64  }
 0x35d   : > { %v1933_v10 = vmul.f32 %v1932_v0, %v1930_v2  ;;  %v2088_v0 = vunpack.c.l.bf16 %v2087_v57 }
 0x35f   : > { %v1934_v19 = vadd.f32 %v1933_v10, %v1921_v15 }
 0x360   : > { %v1941_v36 = vpop.permute.xlu1 %1940 }
 0x361   : > { %v1943_v7 = vsel %vm1868_vm2, %v1937_v43, %v1941_v36 }
 0x362   : > { %v1946_v16 = vmul.f32 %v1945_v6, %v1943_v7  ;;  %v2101_v7 = vunpack.c.h.bf16 %v2087_v57 }
 0x364   : > { %v1947_v26 = vadd.f32 %v1946_v16, %v1934_v19 }
 0x365   : > { %v1950_v37 = vpop.permute.xlu1 %1949 }
 0x366   : > { %v1956_v12 = vsel %vm1868_vm2, %v1950_v37, %v1954_v46 }
 0x367   : > { %v1959_v20 = vmul.f32 %v1958_v11, %v1956_v12 }
 0x369   : > { %v1960_v31 = vadd.f32 %v1959_v20, %v1947_v26 }
 0x36a   : > { %v1963_v38 = vpop.permute.xlu1 %1962 }
 0x36f   : > { %v1967_v39 = vpop.permute.xlu1 %1966 }
 0x370   : > { %v1969_v18 = vsel %vm1868_vm2, %v1963_v38, %v1967_v39  ;;  %v2023_v38 = vunpack.c.h.bf16 %v2009_v23 }
 0x371   : > { %v1972_v27 = vmul.f32 %v1971_v17, %v1969_v18 }
 0x373   : > { %v1973_v36 = vadd.f32 %v1972_v27, %v1960_v31 }
 0x374   : > { %v1980_v40 = vpop.permute.xlu1 %1979 }
 0x375   : > { %v1982_v22 = vsel %vm1868_vm2, %v1976_v48, %v1980_v40 }
 0x376   : > { %v1985_v32 = vmul.f32 %v1984_v21, %v1982_v22 }
 0x378   : > { %v1986_v43 = vadd.f32 %v1985_v32, %v1973_v36 }
 0x379   : > { %v1989_v42 = vpop.permute.xlu1 %1988 }
 0x37a   : > { %v1995_v30 = vsel %vm1868_vm2, %v1989_v42, %v1993_v59  ;;  %v2036_v42 = vunpack.c.l.bf16 %v2035_v35 }
 0x37b   : > { %v1998_v37 = vmul.f32 %v1997_v28, %v1995_v30 }
 0x37d   : > { %v1999_v50 = vadd.f32 %v1998_v37, %v1986_v43 }
 0x37e   : > { %v2002_v44 = vpop.permute.xlu1 %2001 }
 0x383   : > { %v2006_v45 = vpop.permute.xlu1 %2005 }
 0x384   : > { %v2008_v34 = vsel %vm1868_vm2, %v2002_v44, %v2006_v45  ;;  %v2049_v44 = vunpack.c.h.bf16 %v2035_v35 }
 0x385   : > { %v2011_v46 = vmul.f32 %v2010_v33, %v2008_v34 }
 0x387   : > { %v2012_v52 = vadd.f32 %v2011_v46, %v1999_v50 }
 0x388   : > { %v2019_v47 = vpop.permute.xlu1 %2018 }
 0x389   : > { %v2021_v39 = vsel %vm1868_vm2, %v2015_v8, %v2019_v47  ;;  %v2093_v8 = vpop.permute.xlu0 %2092 }
 0x38a   : > { %v2024_v51 = vmul.f32 %v2023_v38, %v2021_v39 }
 0x38c   : > { %v2025_v59 = vadd.f32 %v2024_v51, %v2012_v52 }
 0x38d   : > { %v2028_v53 = vpop.permute.xlu1 %2027 }
 0x38e   : > { %v2034_v48 = vsel %vm1868_vm2, %v2028_v53, %v2032_v24 }
 0x38f   : > { %v2037_v54 = vmul.f32 %v2036_v42, %v2034_v48 }
 0x391   : > { %v2038_v62 = vadd.f32 %v2037_v54, %v2025_v59 }
 0x392   : > { %v2041_v1 = vpop.permute.xlu1 %2040 }
 0x397   : > { %v2045_v14 = vpop.permute.xlu1 %2044 }
 0x398   : > { %v2047_v45 = vsel %vm1868_vm2, %v2041_v1, %v2045_v14 }
 0x399   : > { %v2050_v60 = vmul.f32 %v2049_v44, %v2047_v45 }
 0x39b   : > { %v2051_v1 = vadd.f32 %v2050_v60, %v2038_v62 }
 0x39c   : > { %v2058_v29 = vpop.permute.xlu1 %2057 }
 0x39d   : > { %v2060_v56 = vsel %vm1868_vm2, %v2054_v41, %v2058_v29 }
 0x39e   : > { %v2063_v63 = vmul.f32 %v2062_v55, %v2060_v56 }
 0x3a0   : > { %v2064_v5 = vadd.f32 %v2063_v63, %v2051_v1 }
 0x3a1   : > { %v2067_v40 = vpop.permute.xlu1 %2066 }
 0x3a2   : > { %v2073_v53 = vsel %vm1868_vm2, %v2067_v40, %v2071_v58 }
 0x3a3   : > { %v2076_v3 = vmul.f32 %v2075_v61, %v2073_v53 }
 0x3a5   : > { %v2077_v9 = vadd.f32 %v2076_v3, %v2064_v5 }
 0x3a6   : > { %v2080_v47 = vpop.permute.xlu1 %2079 }
 0x3ab   : > { %v2084_v2 = vpop.permute.xlu1 %2083 }
 0x3ac   : > { %v2086_v4 = vsel %vm1868_vm2, %v2080_v47, %v2084_v2 }
 0x3ad   : > { %v2089_v6 = vmul.f32 %v2088_v0, %v2086_v4 }
 0x3af   : > { %v2090_v12 = vadd.f32 %v2089_v6, %v2077_v9 }
 0x3b0   : > { %v2097_v10 = vpop.permute.xlu1 %2096 }
 0x3b1   : > { %v2099_v11 = vsel %vm1868_vm2, %v2093_v8, %v2097_v10 }
 0x3b2   : > { %v2102_v13 = vmul.f32 %v2101_v7, %v2099_v11 }
 0x3b4   : > { %v2103_v14 = vadd.f32 %v2102_v13, %v2090_v12 }
 0x3b6   : > { %2104 = vrot.lane.b32.xlu1 %v2103_v14, %s2946_s26 }
 0x428   : > { %v2105_v15 = vpop.permute.xlu1 %2104 }
 0x429   : > { %v2106_v16 = vadd.f32 %v2105_v15, %v2103_v14 }
 0x42b   : > { %2108 = vst.msk [vmem:[%s232_s18] sm:$0xff] %vm2107_vm3, %v2106_v16 }
 0x42c   : > { %2861 = shalt.err (!%p2858_p3)
}
 0x42d   : > { %s2862_s10 = scalar_lea.hbm %s2121_s6, 128  ;;  %s2866_s15 = scalar_lea.hbm %s3612_s5, 384 }
 0x42e   : > { %p2863_p4 = scmp.ne.s32.totalorder %s2121_s6, %s2862_s10  ;;  %p2867_p9 = scmp.lt.s32.totalorder %s2121_s6, %s3612_s5 }
 0x42f   : > { %p2868_p10 = scmp.lt.s32.totalorder %s2866_s15, %s2862_s10 }
 0x430   : > { %p2864_p7 = pnand %p2863_p4, %p3019_p5 }
 0x431   : > { %p2869_p11 = por %p2868_p10, %p2867_p9 }
 0x432   : > { %p2865_p8 = pneg %p2864_p7 }
 0x434   : > { %p2870_p12 = pnand %p2869_p11, %p2865_p8 }
 0x436   : > { %2873 = shalt.err (!%p2870_p12)
}
 0x437   : > { %2568 = dma.vmem_to_hbm [thread:$0]  (%p3019_p5), %s2124_s19, 128, %s2121_s6, %s2110_s7  }
 0x438 PF: > { %p2574_p13 = scmp.ge.s32.totalorder %s2908_s23, 2  ;;  %s2135_s17 = sand.u32 1, %s2896_s20  }
 0x439   : > { %s2136_s12 = scalar_lea.sflag [#allocation4], %s2135_s17 }
 0x43a   : > { %p2571_p0 = pnand %p2574_p13, %p3023_p6 }
 0x43c   : > { %p2572_p1 = pneg %p2571_p0 }
 0x43e   : > { %2891 = dma.done.wait (%p2572_p1), %s2136_s12, 128  }
 0x43f   : > { %2893 = vsyncadd (%p2572_p1), %s2136_s12, 4294967168  ;;  %p17_p2 = scmp.ge.s32.totalorder %s3006_s25, 5   ;;  %s3615_s20 = smov %s2900_s21 }
 0x440   : > { %s3616_s21 = smov %s2904_s22  ;;  %s3617_s22 = smov %s3017_s28 }
 0x441   : > { %s3618_s23 = smov %s3006_s25  ;;  %19 = sbr.rel (!%p17_p2) target bundleno = 6 (0x6), region = 78 }
 0x446   :  { %2141 = vsyncpa [#allocation4], 1 }
 0x447   :  { %2143 = vsyncpa [#allocation4 + $0x1], 1 }

</bundles_post_ra>
